<compile_context>
chip_gen: v7x
topology: tpu7x:2x2x1
jax: 0.10.0
libtpu: 0.0.40
codegen_flags: <defaults>
</compile_context>

<pallas_src>
import functools
from typing import NamedTuple

import jax
import jax.numpy as jnp
from jax.experimental import pallas as pl
from jax.experimental.pallas import tpu as pltpu

MIB = 1024 * 1024


def _round_up(a, b):
    return (a + b - 1) // b * b


def _chip_info():
    """Returns (vmem_capacity_bytes, mxu_width) with conservative fallbacks."""
    vmem = 64 * MIB          # conservative (v7x per-TC budget)
    mxu = 128
    try:
        vmem = int(pltpu.get_tpu_info().vmem_capacity_bytes)
    except Exception:
        pass
    try:
        kind = jax.devices()[0].device_kind.lower()
        if "v6" in kind or "v7" in kind:
            mxu = 256
    except Exception:
        pass
    return vmem, mxu


class GNFFPacked(NamedTuple):
    wx: jax.Array      # (Hp, 2*Hp) compute dtype: [W1 | Wg_x - Wg_d]
    bx: jax.Array      # (1, 2*Hp)  f32:           [b1 | 0]
    w2: jax.Array      # (Hp, Hp)
    b2: jax.Array      # (1, Hp)
    wgy: jax.Array     # (Hp, Hp): Wg_y + Wg_d
    bg: jax.Array      # (1, Hp)
    gamma: jax.Array   # (1, Hp)
    beta: jax.Array    # (1, Hp)
    hidden: int
    hidden_padded: int


def pack_params(params, *, compute_dtype=jnp.bfloat16, lane_align=None):
    """Fuse / pad / cast the weights ONCE (call outside the per-step path)."""
    w1, b1, w2, b2 = params["w1"], params["b1"], params["w2"], params["b2"]
    wg, bg = params["wg"], params["bg"]
    gamma, beta = params["gamma"], params["beta"]
    H = w1.shape[0]

    if lane_align is None:
        _, mxu = _chip_info()
        Hp = _round_up(H, 128)
        # 256-wide-MXU chips: avoid a half-width trailing 128 chunk.
        if mxu >= 256 and Hp > 128 and (Hp // 128) % 2 == 1:
            Hp = _round_up(H, 256)
    else:
        Hp = _round_up(H, lane_align)

    # Gate fusion (concat order is [y, x, y - x]):
    #   cat(y, x, y-x) @ Wg == y @ (Wg_y + Wg_d) + x @ (Wg_x - Wg_d)
    wg_y, wg_x, wg_d = wg[:H], wg[H:2 * H], wg[2 * H:]
    wg_yd = wg_y + wg_d
    wg_xd = wg_x - wg_d

    def pad_mat(w):   # (H,H) -> (Hp,Hp), zero-padded, matmul operand dtype
        return jnp.zeros((Hp, Hp), compute_dtype).at[:H, :H].set(
            w.astype(compute_dtype))

    def pad_vec(v):   # (H,) -> (1,Hp), zero-padded, f32 (added post-matmul)
        return jnp.zeros((1, Hp), jnp.float32).at[0, :H].set(
            v.astype(jnp.float32))

    # x-side fusion: one (Hp, 2*Hp) weight feeding both W1 and the x-gate term.
    wx = jnp.concatenate([pad_mat(w1), pad_mat(wg_xd)], axis=1)
    bx = jnp.concatenate([pad_vec(b1), jnp.zeros((1, Hp), jnp.float32)], axis=1)

    return GNFFPacked(wx=wx, bx=bx, w2=pad_mat(w2), b2=pad_vec(b2),
                      wgy=pad_mat(wg_yd), bg=pad_vec(bg),
                      gamma=pad_vec(gamma), beta=pad_vec(beta),
                      hidden=H, hidden_padded=Hp)


def gnff_kernel(x_ref, wx_ref, bx_ref, w2_ref, b2_ref, wgy_ref, bg_ref,
                gamma_ref, beta_ref, o_ref, *, h_real, h_pad):
    mm_dtype = wx_ref.dtype                       # MXU operand dtype (bf16 or f32)
    x_mm = x_ref[...].astype(mm_dtype)

    # ---- fused x-side matmul: [h_pre | gate_x] = x @ [W1 | Wg_x - Wg_d] + [b1 | 0]
    xh = jnp.dot(x_mm, wx_ref[...], preferred_element_type=jnp.float32) + bx_ref[...]
    h = xh[:, :h_pad]
    gx = xh[:, h_pad:]

    # ---- FeedForward: LeakyReLU -> Dropout(identity, eval) -> Linear2
    h = jnp.maximum(h, 0.01 * h)                  # LeakyReLU, negative_slope=0.01
    # TODO(synk): training-mode Dropout omitted (identity at inference).
    y = jnp.dot(h.astype(mm_dtype), w2_ref[...],
                preferred_element_type=jnp.float32) + b2_ref[...]

    # ---- GateResidue (fused): sigmoid(y @ (Wg_y + Wg_d) + x @ (Wg_x - Wg_d) + bg)
    g_lin = (jnp.dot(y.astype(mm_dtype), wgy_ref[...],
                     preferred_element_type=jnp.float32) + gx + bg_ref[...])
    g = jax.nn.sigmoid(g_lin)

    # Residual: re-load x from VMEM (cheap ld, keeps the f32 live-set small).
    z = y * g + x_ref[...].astype(jnp.float32)    # padded lanes remain exactly 0

    # ---- LayerNorm over the real hidden dim (one-pass; pad lanes add 0 to sums)
    inv_h = 1.0 / float(h_real)
    s1 = jnp.sum(z, axis=-1, keepdims=True)
    s2 = jnp.sum(z * z, axis=-1, keepdims=True)
    mean = s1 * inv_h
    var = jnp.maximum(s2 * inv_h - mean * mean, 0.0)
    zn = (z - mean) * jax.lax.rsqrt(var + 1e-5)
    # gamma/beta padded with zeros -> padded output lanes are exactly 0.
    o_ref[...] = (zn * gamma_ref[...] + beta_ref[...]).astype(o_ref.dtype)


def _pick_row_tile(n_rows, desired):
    desired = max(8, _round_up(desired, 8))
    if n_rows <= desired:
        return _round_up(n_rows, 8)               # single tile
    # Prefer a tile that exactly divides N (no row padding / output slicing),
    # as long as it is not pathologically small.
    for cand in range(desired, 0, -8):
        if n_rows % cand == 0:
            if cand >= 128 or cand >= desired // 2:
                return cand
            break
    return desired                                 # fall back: pad rows


def gate_norm_feed_forward(x, packed, *, row_tile=None, vmem_limit_bytes=None,
                           single_buffer_weights=True):
    """x: (batch, seq, hidden) float32. `packed` from pack_params(). Same shape out."""
    B, S, H = x.shape
    assert H == packed.hidden, "packed params built for a different hidden size"
    Hp = packed.hidden_padded
    N = B * S

    vmem_cap, _ = _chip_info()
    big_vmem = vmem_cap >= 96 * MIB
    if vmem_limit_bytes is None:
        # Leave headroom below the physical budget (v7x: 64 MiB is *all* of VMEM).
        vmem_limit_bytes = 104 * MIB if big_vmem else 52 * MIB
    if row_tile is None:
        desired = (512 if big_vmem else 256) if Hp <= 2048 else (256 if big_vmem else 128)
        row_tile = _pick_row_tile(N, desired)
    else:
        row_tile = max(8, _round_up(row_tile, 8))

    Np = _round_up(N, row_tile)
    grid = (Np // row_tile,)

    # Only pad / slice activations when genuinely needed: each is a full extra
    # HBM read+write pass outside the kernel.
    x2 = x.reshape(N, H)
    need_pad = (Np != N) or (Hp != H)
    if need_pad:
        x2 = jnp.zeros((Np, Hp), x.dtype).at[:N, :H].set(x2)

    mm_itemsize = jnp.dtype(packed.wx.dtype).itemsize
    cost = pl.CostEstimate(
        flops=2 * Np * Hp * Hp * 4,               # 4 Hp x Hp matmul-equivalents / row
        transcendentals=Np * Hp + Np,             # sigmoid + rsqrt
        bytes_accessed=2 * Np * Hp * x.dtype.itemsize
                       + 4 * Hp * Hp * mm_itemsize + 8 * Hp * 4,
    )

    kern = functools.partial(gnff_kernel, h_real=H, h_pad=Hp)

    def build_and_run(single_buffer):
        if single_buffer:
            # Constant index_map => loaded once; the second buffer is pure waste.
            def w_spec(shape):
                return pl.BlockSpec(shape, lambda i: (0, 0),
                                    pipeline_mode=pl.Buffered(1))
        else:
            def w_spec(shape):
                return pl.BlockSpec(shape, lambda i: (0, 0))

        call = pl.pallas_call(
            kern,
            out_shape=jax.ShapeDtypeStruct((Np, Hp), x.dtype),
            grid_spec=pltpu.PrefetchScalarGridSpec(
                num_scalar_prefetch=0,
                grid=grid,
                in_specs=[
                    pl.BlockSpec((row_tile, Hp), lambda i: (i, 0)),   # x rows (streamed)
                    w_spec((Hp, 2 * Hp)), w_spec((1, 2 * Hp)),        # [W1 | Wg_xd], [b1|0]
                    w_spec((Hp, Hp)), w_spec((1, Hp)),                # W2, b2
                    w_spec((Hp, Hp)), w_spec((1, Hp)),                # Wg_yd, bg
                    w_spec((1, Hp)), w_spec((1, Hp)),                 # gamma, beta
                ],
                out_specs=pl.BlockSpec((row_tile, Hp), lambda i: (i, 0)),
            ),
            compiler_params=pltpu.CompilerParams(
                dimension_semantics=("parallel",),
                vmem_limit_bytes=vmem_limit_bytes),
            cost_estimate=cost,
        )
        return call(x2, packed.wx, packed.bx, packed.w2, packed.b2,
                    packed.wgy, packed.bg, packed.gamma, packed.beta)

    if single_buffer_weights:
        try:
            out = build_and_run(True)
        except Exception:
            # pipeline_mode / Buffered(1) unavailable in this build: default buffering.
            out = build_and_run(False)
    else:
        out = build_and_run(False)

    if need_pad:
        out = out[:N, :H]
    return out.reshape(B, S, H)


def init_params(key, hidden):
    """Deterministic synthetic init (PyTorch-like uniform fan-in bounds)."""
    ks = jax.random.split(key, 6)

    def lin(k, fan_in, fan_out):
        bound = 1.0 / jnp.sqrt(fan_in)
        kw, kb = jax.random.split(k)
        w = jax.random.uniform(kw, (fan_in, fan_out), jnp.float32, -bound, bound)
        b = jax.random.uniform(kb, (fan_out,), jnp.float32, -bound, bound)
        return w, b

    w1, b1 = lin(ks[0], hidden, hidden)           # FF linear 1 (multi=1)
    w2, b2 = lin(ks[1], hidden, hidden)           # FF linear 2
    wg, bg = lin(ks[2], 3 * hidden, hidden)       # gate linear
    gamma = jnp.ones((hidden,), jnp.float32)      # LayerNorm weight
    beta = jnp.zeros((hidden,), jnp.float32)      # LayerNorm bias
    return dict(w1=w1, b1=b1, w2=w2, b2=b2, wg=wg, bg=bg, gamma=gamma, beta=beta)


def reference(x, p):
    """Pure-JAX f32 reference for sanity checking."""
    h = x @ p["w1"] + p["b1"]
    h = jnp.where(h > 0, h, 0.01 * h)
    y = h @ p["w2"] + p["b2"]
    cat = jnp.concatenate([y, x, y - x], axis=-1)
    g = jax.nn.sigmoid(cat @ p["wg"] + p["bg"])
    z = y * g + x
    mean = jnp.mean(z, axis=-1, keepdims=True)
    var = jnp.mean((z - mean) ** 2, axis=-1, keepdims=True)
    return (z - mean) / jnp.sqrt(var + 1e-5) * p["gamma"] + p["beta"]


if __name__ == "__main__":
    key = jax.random.PRNGKey(0)
    kx, kp = jax.random.split(key)

    batch, seq, hidden = 2, 8, 32
    x = jax.random.normal(kx, (batch, seq, hidden), jnp.float32)
    params = init_params(kp, hidden)

    ref = reference(x, params)

    # Pack weights ONCE, outside the per-call path.
    packed_f32 = pack_params(params, compute_dtype=jnp.float32)
    packed_bf16 = pack_params(params, compute_dtype=jnp.bfloat16)

    # Exact-precision path (f32 MXU operands): tight numerical check.
    out_f32 = jax.block_until_ready(gate_norm_feed_forward(x, packed_f32))
    assert out_f32.shape == (batch, seq, hidden)
    assert jnp.allclose(out_f32, ref, atol=1e-4, rtol=1e-4), "f32 path mismatch"

    # Fast path (default): bf16 MXU operands, f32 accumulation & elementwise.
    out_bf16 = jax.block_until_ready(gate_norm_feed_forward(x, packed_bf16))
    assert out_bf16.shape == (batch, seq, hidden)
    assert jnp.allclose(out_bf16, ref, atol=5e-2, rtol=5e-2), "bf16 path mismatch"

    print("KERNEL_OK")
</pallas_src>

<mosaic_0001>
module attributes {stable_mosaic.version = 11 : i64} {
  func.func @gnff_kernel(%arg0: i32, %arg1: memref<16x128xf32, #tpu.memory_space<vmem>>, %arg2: memref<128x256xf32, #tpu.memory_space<vmem>>, %arg3: memref<1x256xf32, #tpu.memory_space<vmem>>, %arg4: memref<128x128xf32, #tpu.memory_space<vmem>>, %arg5: memref<1x128xf32, #tpu.memory_space<vmem>>, %arg6: memref<128x128xf32, #tpu.memory_space<vmem>>, %arg7: memref<1x128xf32, #tpu.memory_space<vmem>>, %arg8: memref<1x128xf32, #tpu.memory_space<vmem>>, %arg9: memref<1x128xf32, #tpu.memory_space<vmem>>, %arg10: memref<16x128xf32, #tpu.memory_space<vmem>>) attributes {dimension_semantics = [#tpu.dimension_semantics<parallel>], iteration_bounds = array<i64: 1>, scalar_prefetch = 0 : i64, scratch_operands = 0 : i64, tpu.core_type = #tpu.core_type<tc>, window_params = [{transform_indices = @transform_0, window_bounds = array<i64: 16, 128>}, {pipeline_mode = #tpu.pipeline_mode<synchronous>, transform_indices = @transform_1, window_bounds = array<i64: 128, 256>}, {pipeline_mode = #tpu.pipeline_mode<synchronous>, transform_indices = @transform_2, window_bounds = array<i64: 1, 256>}, {pipeline_mode = #tpu.pipeline_mode<synchronous>, transform_indices = @transform_3, window_bounds = array<i64: 128, 128>}, {pipeline_mode = #tpu.pipeline_mode<synchronous>, transform_indices = @transform_4, window_bounds = array<i64: 1, 128>}, {pipeline_mode = #tpu.pipeline_mode<synchronous>, transform_indices = @transform_5, window_bounds = array<i64: 128, 128>}, {pipeline_mode = #tpu.pipeline_mode<synchronous>, transform_indices = @transform_6, window_bounds = array<i64: 1, 128>}, {pipeline_mode = #tpu.pipeline_mode<synchronous>, transform_indices = @transform_7, window_bounds = array<i64: 1, 128>}, {pipeline_mode = #tpu.pipeline_mode<synchronous>, transform_indices = @transform_8, window_bounds = array<i64: 1, 128>}, {transform_indices = @transform_9, window_bounds = array<i64: 16, 128>}]} {
    %c0 = arith.constant 0 : index
    %c0_0 = arith.constant 0 : index
    %0 = vector.load %arg1[%c0, %c0_0] : memref<16x128xf32, #tpu.memory_space<vmem>>, vector<16x128xf32>
    %c0_1 = arith.constant 0 : index
    %c0_2 = arith.constant 0 : index
    %1 = vector.load %arg2[%c0_1, %c0_2] : memref<128x256xf32, #tpu.memory_space<vmem>>, vector<128x256xf32>
    %cst = arith.constant dense<0.000000e+00> : vector<16x256xf32>
    %2 = tpu.matmul %0, %1, %cst {dimension_numbers = #tpu.dot_dimension_numbers<[1], [0], [0], [1], [0, 0, 1, 1], [], []>} : vector<16x128xf32>, vector<128x256xf32>, vector<16x256xf32> -> vector<16x256xf32>
    %c0_3 = arith.constant 0 : index
    %c0_4 = arith.constant 0 : index
    %3 = vector.load %arg3[%c0_3, %c0_4] : memref<1x256xf32, #tpu.memory_space<vmem>>, vector<1x256xf32>
    %4 = vector.broadcast %3 : vector<1x256xf32> to vector<16x256xf32>
    %5 = arith.addf %2, %4 : vector<16x256xf32>
    %6 = vector.extract_strided_slice %5 {offsets = [0, 0], sizes = [16, 128], strides = [1, 1]} : vector<16x256xf32> to vector<16x128xf32>
    %7 = vector.extract_strided_slice %5 {offsets = [0, 128], sizes = [16, 128], strides = [1, 1]} : vector<16x256xf32> to vector<16x128xf32>
    %cst_5 = arith.constant 0.00999999977 : f32
    %8 = vector.broadcast %cst_5 : f32 to vector<16x128xf32>
    %9 = arith.mulf %8, %6 : vector<16x128xf32>
    %10 = arith.maximumf %6, %9 : vector<16x128xf32>
    %c0_6 = arith.constant 0 : index
    %c0_7 = arith.constant 0 : index
    %11 = vector.load %arg4[%c0_6, %c0_7] : memref<128x128xf32, #tpu.memory_space<vmem>>, vector<128x128xf32>
    %cst_8 = arith.constant dense<0.000000e+00> : vector<16x128xf32>
    %12 = tpu.matmul %10, %11, %cst_8 {dimension_numbers = #tpu.dot_dimension_numbers<[1], [0], [0], [1], [0, 0, 1, 1], [], []>} : vector<16x128xf32>, vector<128x128xf32>, vector<16x128xf32> -> vector<16x128xf32>
    %c0_9 = arith.constant 0 : index
    %c0_10 = arith.constant 0 : index
    %13 = vector.load %arg5[%c0_9, %c0_10] : memref<1x128xf32, #tpu.memory_space<vmem>>, vector<1x128xf32>
    %14 = vector.broadcast %13 : vector<1x128xf32> to vector<16x128xf32>
    %15 = arith.addf %12, %14 : vector<16x128xf32>
    %c0_11 = arith.constant 0 : index
    %c0_12 = arith.constant 0 : index
    %16 = vector.load %arg6[%c0_11, %c0_12] : memref<128x128xf32, #tpu.memory_space<vmem>>, vector<128x128xf32>
    %cst_13 = arith.constant dense<0.000000e+00> : vector<16x128xf32>
    %17 = tpu.matmul %15, %16, %cst_13 {dimension_numbers = #tpu.dot_dimension_numbers<[1], [0], [0], [1], [0, 0, 1, 1], [], []>} : vector<16x128xf32>, vector<128x128xf32>, vector<16x128xf32> -> vector<16x128xf32>
    %18 = arith.addf %17, %7 : vector<16x128xf32>
    %c0_14 = arith.constant 0 : index
    %c0_15 = arith.constant 0 : index
    %19 = vector.load %arg7[%c0_14, %c0_15] : memref<1x128xf32, #tpu.memory_space<vmem>>, vector<1x128xf32>
    %20 = vector.broadcast %19 : vector<1x128xf32> to vector<16x128xf32>
    %21 = arith.addf %18, %20 : vector<16x128xf32>
    %22 = arith.negf %21 : vector<16x128xf32>
    %23 = math.exp %22 : vector<16x128xf32>
    %cst_16 = arith.constant 1.000000e+00 : f32
    %24 = vector.broadcast %cst_16 : f32 to vector<16x128xf32>
    %25 = arith.addf %24, %23 : vector<16x128xf32>
    %26 = arith.divf %24, %25 : vector<16x128xf32>
    %27 = arith.mulf %15, %26 : vector<16x128xf32>
    %c0_17 = arith.constant 0 : index
    %c0_18 = arith.constant 0 : index
    %28 = vector.load %arg1[%c0_17, %c0_18] : memref<16x128xf32, #tpu.memory_space<vmem>>, vector<16x128xf32>
    %29 = arith.addf %27, %28 : vector<16x128xf32>
    %cst_19 = arith.constant dense<0.000000e+00> : vector<16xf32>
    %30 = vector.multi_reduction <add>, %29, %cst_19 [1] : vector<16x128xf32> to vector<16xf32>
    %31 = vector.shape_cast %30 : vector<16xf32> to vector<16x1xf32>
    %32 = arith.mulf %29, %29 : vector<16x128xf32>
    %cst_20 = arith.constant dense<0.000000e+00> : vector<16xf32>
    %33 = vector.multi_reduction <add>, %32, %cst_20 [1] : vector<16x128xf32> to vector<16xf32>
    %34 = vector.shape_cast %33 : vector<16xf32> to vector<16x1xf32>
    %cst_21 = arith.constant 3.125000e-02 : f32
    %35 = vector.broadcast %cst_21 : f32 to vector<16x1xf32>
    %36 = arith.mulf %31, %35 : vector<16x1xf32>
    %cst_22 = arith.constant 3.125000e-02 : f32
    %37 = vector.broadcast %cst_22 : f32 to vector<16x1xf32>
    %38 = arith.mulf %34, %37 : vector<16x1xf32>
    %39 = arith.mulf %36, %36 : vector<16x1xf32>
    %40 = arith.subf %38, %39 : vector<16x1xf32>
    %cst_23 = arith.constant 0.000000e+00 : f32
    %41 = vector.broadcast %cst_23 : f32 to vector<16x1xf32>
    %42 = arith.maximumf %40, %41 : vector<16x1xf32>
    %43 = vector.broadcast %36 : vector<16x1xf32> to vector<16x128xf32>
    %44 = arith.subf %29, %43 : vector<16x128xf32>
    %cst_24 = arith.constant 9.99999974E-6 : f32
    %45 = vector.broadcast %cst_24 : f32 to vector<16x1xf32>
    %46 = arith.addf %42, %45 : vector<16x1xf32>
    %47 = math.rsqrt %46 : vector<16x1xf32>
    %48 = vector.broadcast %47 : vector<16x1xf32> to vector<16x128xf32>
    %49 = arith.mulf %44, %48 : vector<16x128xf32>
    %c0_25 = arith.constant 0 : index
    %c0_26 = arith.constant 0 : index
    %50 = vector.load %arg8[%c0_25, %c0_26] : memref<1x128xf32, #tpu.memory_space<vmem>>, vector<1x128xf32>
    %51 = vector.broadcast %50 : vector<1x128xf32> to vector<16x128xf32>
    %52 = arith.mulf %49, %51 : vector<16x128xf32>
    %c0_27 = arith.constant 0 : index
    %c0_28 = arith.constant 0 : index
    %53 = vector.load %arg9[%c0_27, %c0_28] : memref<1x128xf32, #tpu.memory_space<vmem>>, vector<1x128xf32>
    %54 = vector.broadcast %53 : vector<1x128xf32> to vector<16x128xf32>
    %55 = arith.addf %52, %54 : vector<16x128xf32>
    %c0_29 = arith.constant 0 : index
    %c0_30 = arith.constant 0 : index
    %56 = vector.load %arg10[%c0_29, %c0_30] : memref<16x128xf32, #tpu.memory_space<vmem>>, vector<16x128xf32>
    tpu.vector_store %arg10[%c0_29, %c0_30], %55 {strides = array<i32>} : memref<16x128xf32, #tpu.memory_space<vmem>>, vector<16x128xf32>,
    return
  }
  func.func @transform_0(%arg0: i32) -> (i32, i32) {
    %c0_i32 = arith.constant 0 : i32
    %c0_i32_0 = arith.constant 0 : i32
    return %arg0, %c0_i32 : i32, i32
  }
  func.func @transform_1(%arg0: i32) -> (i32, i32) {
    %c0_i32 = arith.constant 0 : i32
    %c0_i32_0 = arith.constant 0 : i32
    %c0_i32_1 = arith.constant 0 : i32
    return %c0_i32, %c0_i32_0 : i32, i32
  }
  func.func @transform_2(%arg0: i32) -> (i32, i32) {
    %c0_i32 = arith.constant 0 : i32
    %c0_i32_0 = arith.constant 0 : i32
    %c0_i32_1 = arith.constant 0 : i32
    return %c0_i32, %c0_i32_0 : i32, i32
  }
  func.func @transform_3(%arg0: i32) -> (i32, i32) {
    %c0_i32 = arith.constant 0 : i32
    %c0_i32_0 = arith.constant 0 : i32
    %c0_i32_1 = arith.constant 0 : i32
    return %c0_i32, %c0_i32_0 : i32, i32
  }
  func.func @transform_4(%arg0: i32) -> (i32, i32) {
    %c0_i32 = arith.constant 0 : i32
    %c0_i32_0 = arith.constant 0 : i32
    %c0_i32_1 = arith.constant 0 : i32
    return %c0_i32, %c0_i32_0 : i32, i32
  }
  func.func @transform_5(%arg0: i32) -> (i32, i32) {
    %c0_i32 = arith.constant 0 : i32
    %c0_i32_0 = arith.constant 0 : i32
    %c0_i32_1 = arith.constant 0 : i32
    return %c0_i32, %c0_i32_0 : i32, i32
  }
  func.func @transform_6(%arg0: i32) -> (i32, i32) {
    %c0_i32 = arith.constant 0 : i32
    %c0_i32_0 = arith.constant 0 : i32
    %c0_i32_1 = arith.constant 0 : i32
    return %c0_i32, %c0_i32_0 : i32, i32
  }
  func.func @transform_7(%arg0: i32) -> (i32, i32) {
    %c0_i32 = arith.constant 0 : i32
    %c0_i32_0 = arith.constant 0 : i32
    %c0_i32_1 = arith.constant 0 : i32
    return %c0_i32, %c0_i32_0 : i32, i32
  }
  func.func @transform_8(%arg0: i32) -> (i32, i32) {
    %c0_i32 = arith.constant 0 : i32
    %c0_i32_0 = arith.constant 0 : i32
    %c0_i32_1 = arith.constant 0 : i32
    return %c0_i32, %c0_i32_0 : i32, i32
  }
  func.func @transform_9(%arg0: i32) -> (i32, i32) {
    %c0_i32 = arith.constant 0 : i32
    %c0_i32_0 = arith.constant 0 : i32
    return %arg0, %c0_i32 : i32, i32
  }
}

module attributes {stable_mosaic.version = 11 : i64} {
  func.func @gnff_kernel(%arg0: i32, %arg1: memref<16x128xf32, #tpu.memory_space<vmem>>, %arg2: memref<128x256xf32, #tpu.memory_space<vmem>>, %arg3: memref<1x256xf32, #tpu.memory_space<vmem>>, %arg4: memref<128x128xf32, #tpu.memory_space<vmem>>, %arg5: memref<1x128xf32, #tpu.memory_space<vmem>>, %arg6: memref<128x128xf32, #tpu.memory_space<vmem>>, %arg7: memref<1x128xf32, #tpu.memory_space<vmem>>, %arg8: memref<1x128xf32, #tpu.memory_space<vmem>>, %arg9: memref<1x128xf32, #tpu.memory_space<vmem>>, %arg10: memref<16x128xf32, #tpu.memory_space<vmem>>) attributes {dimension_semantics = [#tpu.dimension_semantics<parallel>], iteration_bounds = array<i64: 1>, scalar_prefetch = 0 : i64, scratch_operands = 0 : i64, tpu.core_type = #tpu.core_type<tc>, window_params = [{transform_indices = @transform_0, window_bounds = array<i64: 16, 128>}, {pipeline_mode = #tpu.pipeline_mode<synchronous>, transform_indices = @transform_1, window_bounds = array<i64: 128, 256>}, {pipeline_mode = #tpu.pipeline_mode<synchronous>, transform_indices = @transform_2, window_bounds = array<i64: 1, 256>}, {pipeline_mode = #tpu.pipeline_mode<synchronous>, transform_indices = @transform_3, window_bounds = array<i64: 128, 128>}, {pipeline_mode = #tpu.pipeline_mode<synchronous>, transform_indices = @transform_4, window_bounds = array<i64: 1, 128>}, {pipeline_mode = #tpu.pipeline_mode<synchronous>, transform_indices = @transform_5, window_bounds = array<i64: 128, 128>}, {pipeline_mode = #tpu.pipeline_mode<synchronous>, transform_indices = @transform_6, window_bounds = array<i64: 1, 128>}, {pipeline_mode = #tpu.pipeline_mode<synchronous>, transform_indices = @transform_7, window_bounds = array<i64: 1, 128>}, {pipeline_mode = #tpu.pipeline_mode<synchronous>, transform_indices = @transform_8, window_bounds = array<i64: 1, 128>}, {transform_indices = @transform_9, window_bounds = array<i64: 16, 128>}]} {
    %c0 = arith.constant 0 : index
    %c0_0 = arith.constant 0 : index
    %0 = vector.load %arg1[%c0, %c0_0] : memref<16x128xf32, #tpu.memory_space<vmem>>, vector<16x128xf32>
    %c0_1 = arith.constant 0 : index
    %c0_2 = arith.constant 0 : index
    %1 = vector.load %arg2[%c0_1, %c0_2] : memref<128x256xf32, #tpu.memory_space<vmem>>, vector<128x256xf32>
    %cst = arith.constant dense<0.000000e+00> : vector<16x256xf32>
    %2 = tpu.matmul %0, %1, %cst {dimension_numbers = #tpu.dot_dimension_numbers<[1], [0], [0], [1], [0, 0, 1, 1], [], []>} : vector<16x128xf32>, vector<128x256xf32>, vector<16x256xf32> -> vector<16x256xf32>
    %c0_3 = arith.constant 0 : index
    %c0_4 = arith.constant 0 : index
    %3 = vector.load %arg3[%c0_3, %c0_4] : memref<1x256xf32, #tpu.memory_space<vmem>>, vector<1x256xf32>
    %4 = vector.broadcast %3 : vector<1x256xf32> to vector<16x256xf32>
    %5 = arith.addf %2, %4 : vector<16x256xf32>
    %6 = vector.extract_strided_slice %5 {offsets = [0, 0], sizes = [16, 128], strides = [1, 1]} : vector<16x256xf32> to vector<16x128xf32>
    %7 = vector.extract_strided_slice %5 {offsets = [0, 128], sizes = [16, 128], strides = [1, 1]} : vector<16x256xf32> to vector<16x128xf32>
    %cst_5 = arith.constant 0.00999999977 : f32
    %8 = vector.broadcast %cst_5 : f32 to vector<16x128xf32>
    %9 = arith.mulf %8, %6 : vector<16x128xf32>
    %10 = arith.maximumf %6, %9 : vector<16x128xf32>
    %c0_6 = arith.constant 0 : index
    %c0_7 = arith.constant 0 : index
    %11 = vector.load %arg4[%c0_6, %c0_7] : memref<128x128xf32, #tpu.memory_space<vmem>>, vector<128x128xf32>
    %cst_8 = arith.constant dense<0.000000e+00> : vector<16x128xf32>
    %12 = tpu.matmul %10, %11, %cst_8 {dimension_numbers = #tpu.dot_dimension_numbers<[1], [0], [0], [1], [0, 0, 1, 1], [], []>} : vector<16x128xf32>, vector<128x128xf32>, vector<16x128xf32> -> vector<16x128xf32>
    %c0_9 = arith.constant 0 : index
    %c0_10 = arith.constant 0 : index
    %13 = vector.load %arg5[%c0_9, %c0_10] : memref<1x128xf32, #tpu.memory_space<vmem>>, vector<1x128xf32>
    %14 = vector.broadcast %13 : vector<1x128xf32> to vector<16x128xf32>
    %15 = arith.addf %12, %14 : vector<16x128xf32>
    %c0_11 = arith.constant 0 : index
    %c0_12 = arith.constant 0 : index
    %16 = vector.load %arg6[%c0_11, %c0_12] : memref<128x128xf32, #tpu.memory_space<vmem>>, vector<128x128xf32>
    %cst_13 = arith.constant dense<0.000000e+00> : vector<16x128xf32>
    %17 = tpu.matmul %15, %16, %cst_13 {dimension_numbers = #tpu.dot_dimension_numbers<[1], [0], [0], [1], [0, 0, 1, 1], [], []>} : vector<16x128xf32>, vector<128x128xf32>, vector<16x128xf32> -> vector<16x128xf32>
    %18 = arith.addf %17, %7 : vector<16x128xf32>
    %c0_14 = arith.constant 0 : index
    %c0_15 = arith.constant 0 : index
    %19 = vector.load %arg7[%c0_14, %c0_15] : memref<1x128xf32, #tpu.memory_space<vmem>>, vector<1x128xf32>
    %20 = vector.broadcast %19 : vector<1x128xf32> to vector<16x128xf32>
    %21 = arith.addf %18, %20 : vector<16x128xf32>
    %22 = arith.negf %21 : vector<16x128xf32>
    %23 = math.exp %22 : vector<16x128xf32>
    %cst_16 = arith.constant 1.000000e+00 : f32
    %24 = vector.broadcast %cst_16 : f32 to vector<16x128xf32>
    %25 = arith.addf %24, %23 : vector<16x128xf32>
    %26 = arith.divf %24, %25 : vector<16x128xf32>
    %27 = arith.mulf %15, %26 : vector<16x128xf32>
    %c0_17 = arith.constant 0 : index
    %c0_18 = arith.constant 0 : index
    %28 = vector.load %arg1[%c0_17, %c0_18] : memref<16x128xf32, #tpu.memory_space<vmem>>, vector<16x128xf32>
    %29 = arith.addf %27, %28 : vector<16x128xf32>
    %cst_19 = arith.constant dense<0.000000e+00> : vector<16xf32>
    %30 = vector.multi_reduction <add>, %29, %cst_19 [1] : vector<16x128xf32> to vector<16xf32>
    %31 = vector.shape_cast %30 : vector<16xf32> to vector<16x1xf32>
    %32 = arith.mulf %29, %29 : vector<16x128xf32>
    %cst_20 = arith.constant dense<0.000000e+00> : vector<16xf32>
    %33 = vector.multi_reduction <add>, %32, %cst_20 [1] : vector<16x128xf32> to vector<16xf32>
    %34 = vector.shape_cast %33 : vector<16xf32> to vector<16x1xf32>
    %cst_21 = arith.constant 3.125000e-02 : f32
    %35 = vector.broadcast %cst_21 : f32 to vector<16x1xf32>
    %36 = arith.mulf %31, %35 : vector<16x1xf32>
    %cst_22 = arith.constant 3.125000e-02 : f32
    %37 = vector.broadcast %cst_22 : f32 to vector<16x1xf32>
    %38 = arith.mulf %34, %37 : vector<16x1xf32>
    %39 = arith.mulf %36, %36 : vector<16x1xf32>
    %40 = arith.subf %38, %39 : vector<16x1xf32>
    %cst_23 = arith.constant 0.000000e+00 : f32
    %41 = vector.broadcast %cst_23 : f32 to vector<16x1xf32>
    %42 = arith.maximumf %40, %41 : vector<16x1xf32>
    %43 = vector.broadcast %36 : vector<16x1xf32> to vector<16x128xf32>
    %44 = arith.subf %29, %43 : vector<16x128xf32>
    %cst_24 = arith.constant 9.99999974E-6 : f32
    %45 = vector.broadcast %cst_24 : f32 to vector<16x1xf32>
    %46 = arith.addf %42, %45 : vector<16x1xf32>
    %47 = math.rsqrt %46 : vector<16x1xf32>
    %48 = vector.broadcast %47 : vector<16x1xf32> to vector<16x128xf32>
    %49 = arith.mulf %44, %48 : vector<16x128xf32>
    %c0_25 = arith.constant 0 : index
    %c0_26 = arith.constant 0 : index
    %50 = vector.load %arg8[%c0_25, %c0_26] : memref<1x128xf32, #tpu.memory_space<vmem>>, vector<1x128xf32>
    %51 = vector.broadcast %50 : vector<1x128xf32> to vector<16x128xf32>
    %52 = arith.mulf %49, %51 : vector<16x128xf32>
    %c0_27 = arith.constant 0 : index
    %c0_28 = arith.constant 0 : index
    %53 = vector.load %arg9[%c0_27, %c0_28] : memref<1x128xf32, #tpu.memory_space<vmem>>, vector<1x128xf32>
    %54 = vector.broadcast %53 : vector<1x128xf32> to vector<16x128xf32>
    %55 = arith.addf %52, %54 : vector<16x128xf32>
    %c0_29 = arith.constant 0 : index
    %c0_30 = arith.constant 0 : index
    %56 = vector.load %arg10[%c0_29, %c0_30] : memref<16x128xf32, #tpu.memory_space<vmem>>, vector<16x128xf32>
    tpu.vector_store %arg10[%c0_29, %c0_30], %55 {strides = array<i32>} : memref<16x128xf32, #tpu.memory_space<vmem>>, vector<16x128xf32>,
    return
  }
  func.func @transform_0(%arg0: i32) -> (i32, i32) {
    %c0_i32 = arith.constant 0 : i32
    %c0_i32_0 = arith.constant 0 : i32
    return %arg0, %c0_i32 : i32, i32
  }
  func.func @transform_1(%arg0: i32) -> (i32, i32) {
    %c0_i32 = arith.constant 0 : i32
    %c0_i32_0 = arith.constant 0 : i32
    %c0_i32_1 = arith.constant 0 : i32
    return %c0_i32, %c0_i32_0 : i32, i32
  }
  func.func @transform_2(%arg0: i32) -> (i32, i32) {
    %c0_i32 = arith.constant 0 : i32
    %c0_i32_0 = arith.constant 0 : i32
    %c0_i32_1 = arith.constant 0 : i32
    return %c0_i32, %c0_i32_0 : i32, i32
  }
  func.func @transform_3(%arg0: i32) -> (i32, i32) {
    %c0_i32 = arith.constant 0 : i32
    %c0_i32_0 = arith.constant 0 : i32
    %c0_i32_1 = arith.constant 0 : i32
    return %c0_i32, %c0_i32_0 : i32, i32
  }
  func.func @transform_4(%arg0: i32) -> (i32, i32) {
    %c0_i32 = arith.constant 0 : i32
    %c0_i32_0 = arith.constant 0 : i32
    %c0_i32_1 = arith.constant 0 : i32
    return %c0_i32, %c0_i32_0 : i32, i32
  }
  func.func @transform_5(%arg0: i32) -> (i32, i32) {
    %c0_i32 = arith.constant 0 : i32
    %c0_i32_0 = arith.constant 0 : i32
    %c0_i32_1 = arith.constant 0 : i32
    return %c0_i32, %c0_i32_0 : i32, i32
  }
  func.func @transform_6(%arg0: i32) -> (i32, i32) {
    %c0_i32 = arith.constant 0 : i32
    %c0_i32_0 = arith.constant 0 : i32
    %c0_i32_1 = arith.constant 0 : i32
    return %c0_i32, %c0_i32_0 : i32, i32
  }
  func.func @transform_7(%arg0: i32) -> (i32, i32) {
    %c0_i32 = arith.constant 0 : i32
    %c0_i32_0 = arith.constant 0 : i32
    %c0_i32_1 = arith.constant 0 : i32
    return %c0_i32, %c0_i32_0 : i32, i32
  }
  func.func @transform_8(%arg0: i32) -> (i32, i32) {
    %c0_i32 = arith.constant 0 : i32
    %c0_i32_0 = arith.constant 0 : i32
    %c0_i32_1 = arith.constant 0 : i32
    return %c0_i32, %c0_i32_0 : i32, i32
  }
  func.func @transform_9(%arg0: i32) -> (i32, i32) {
    %c0_i32 = arith.constant 0 : i32
    %c0_i32_0 = arith.constant 0 : i32
    return %arg0, %c0_i32 : i32, i32
  }
}

</mosaic_0001>

<bundles_post_ra>
// kernel: tpu_custom_call.1
= control target key start
LH: loop header
LB: loop body
LE: loop exit
PB: predicated region body
PF: predicated region fallthrough
CT: control target
= control target key end

     0   :  { %14 = vsyncpa [#allocation3], 0  ;;  %s1008_s0 = inlined_call_operand.hbm [shape: f32[16,128], index: 0, kind: input, shape index: {}]   ;;  %s1009_s1 = inlined_call_operand.hbm [shape: f32[128,256], index: 1, kind: input, shape index: {}]   ;;  %s1010_s2 = inlined_call_operand.vmem [shape: f32[1,256], index: 2, kind: input, shape index: {}]   ;;  %s1011_s3 = inlined_call_operand.hbm [shape: f32[128,128], index: 3, kind: input, shape index: {}]   ;;  %s1012_s4 = inlined_call_operand.vmem [shape: f32[1,128], index: 4, kind: input, shape index: {}]   ;;  %s1013_s5 = inlined_call_operand.hbm [shape: f32[128,128], index: 5, kind: input, shape index: {}]   ;;  %s1014_s6 = inlined_call_operand.vmem [shape: f32[1,128], index: 6, kind: input, shape index: {}]   ;;  %s1015_s7 = inlined_call_operand.vmem [shape: f32[1,128], index: 7, kind: input, shape index: {}]   ;;  %s1016_s8 = inlined_call_operand.vmem [shape: f32[1,128], index: 8, kind: input, shape index: {}]   ;;  %s1017_s9 = inlined_call_operand.hbm [shape: f32[16,128], index: 9, kind: output, shape index: {}]  }
   0x1   :  { %15 = vsyncpa [#allocation6], 0 }
   0x2   :  { %16 = vsyncpa [#allocation9], 0 }
   0x3   :  { %17 = vsyncpa [#allocation4], 0  ;;  %s844_s30 = smov [#allocation5]   ;;  %s726_s13 = scalar_lea.hbm %s1009_s1, 4096 }
   0x4   :  { %s35_s10 = sshll.u32 %s844_s30, 4  ;;  %p727_p0 = scmp.ne.s32.totalorder %s1009_s1, %s726_s13  ;;  %s36_s10 = int_to_ptr.vmem [resolvable:$true] %s35_s10 }
   0x5   :  { %p730_p1 = scmp.lt.u32.totalorder %s726_s13, %s1009_s1 }
   0x7   :  { %p732_p2 = pnand %p730_p1, %p727_p0 }
   0x9   :  { %735 = shalt.err (!%p732_p2)
}
   0xa   :  { %s736_s18 = scalar_lea.vmem %s36_s10, 4096  ;;  %p741_p4 = scmp.lt.s32.totalorder %s36_s10, %s36_s10 }
   0xb   :  { %p737_p3 = scmp.ne.s32.totalorder %s36_s10, %s736_s18  ;;  %p742_p5 = scmp.lt.s32.totalorder %s736_s18, %s736_s18 }
   0xd   :  { %p743_p6 = por %p742_p5, %p741_p4 }
   0xf   :  { %p744_p7 = pnand %p743_p6, %p737_p3 }
  0x11   :  { %747 = shalt.err (!%p744_p7)
}
  0x12   :  { %s845_s19 = smov 256   ;;  %s846_s20 = smov 16  }
  0x13   :  { %41 = dma.hbm_to_vmem [thread:$0]  %s1009_s1, 4096, %s36_s10, [#allocation6], %s845_s19, %s845_s19, %s846_s20  }
  0x14   :  { %s847_s23 = smov [#allocation2]   ;;  %s748_s27 = scalar_lea.hbm %s1008_s0, 256 }
  0x15   :  { %s23_s24 = sshll.u32 %s847_s23, 4  ;;  %p749_p8 = scmp.ne.s32.totalorder %s1008_s0, %s748_s27  ;;  %s24_s24 = int_to_ptr.vmem [resolvable:$true] %s23_s24 }
  0x16   :  { %p752_p9 = scmp.lt.u32.totalorder %s748_s27, %s1008_s0 }
  0x18   :  { %p754_p10 = pnand %p752_p9, %p749_p8 }
  0x1a   :  { %757 = shalt.err (!%p754_p10)
}
  0x1b   :  { %s758_s12 = scalar_lea.vmem %s24_s24, 256  ;;  %p763_p12 = scmp.lt.s32.totalorder %s24_s24, %s24_s24 }
  0x1c   :  { %p759_p11 = scmp.ne.s32.totalorder %s24_s24, %s758_s12  ;;  %p764_p13 = scmp.lt.s32.totalorder %s758_s12, %s758_s12 }
  0x1e   :  { %p765_p0 = por %p764_p13, %p763_p12 }
  0x20   :  { %p766_p1 = pnand %p765_p0, %p759_p11 }
  0x22   :  { %769 = shalt.err (!%p766_p1)
}
  0x23   :  { %s848_s1 = smov 128   ;;  %s849_s10 = smov 8  }
  0x24   :  { %29 = dma.hbm_to_vmem [thread:$0]  %s1008_s0, 256, %s24_s24, [#allocation3], %s848_s1, %s848_s1, %s849_s10  }
  0x25   :  { %s850_s15 = smov [#allocation7]   ;;  %s851_s17 = smov [#allocation8]  }
  0x26   :  { %s49_s16 = sshll.u32 %s850_s15, 4  ;;  %s63_s18 = sshll.u32 %s851_s17, 4  ;;  %s50_s16 = int_to_ptr.vmem [resolvable:$true] %s49_s16  ;;  %s931_s18 = int_to_ptr.vmem [resolvable:$true] %s63_s18 }
  0x27   :  { %s770_s21 = scalar_lea.hbm %s1011_s3, 2048 }
  0x28   :  { %p771_p2 = scmp.ne.s32.totalorder %s1011_s3, %s770_s21  ;;  %p774_p3 = scmp.lt.u32.totalorder %s770_s21, %s1011_s3 }
  0x2a   :  { %p776_p4 = pnand %p774_p3, %p771_p2 }
  0x2c   :  { %779 = shalt.err (!%p776_p4)
}
  0x2d   :  { %s780_s0 = scalar_lea.vmem %s50_s16, 2048  ;;  %p785_p6 = scmp.lt.s32.totalorder %s50_s16, %s50_s16 }
  0x2e   :  { %p781_p5 = scmp.ne.s32.totalorder %s50_s16, %s780_s0  ;;  %p786_p7 = scmp.lt.s32.totalorder %s780_s0, %s780_s0 }
  0x30   :  { %p787_p8 = por %p786_p7, %p785_p6 }
  0x32   :  { %p788_p9 = pnand %p787_p8, %p781_p5 }
  0x34   :  { %791 = shalt.err (!%p788_p9)
}
  0x35   :  { %55 = dma.hbm_to_vmem [thread:$0]  %s1011_s3, 2048, %s50_s16, [#allocation6], %s848_s1, %s848_s1, %s849_s10  }
  0x36   :  { %s792_s30 = scalar_lea.hbm %s1013_s5, 2048 }
  0x37   :  { %p793_p10 = scmp.ne.s32.totalorder %s1013_s5, %s792_s30  ;;  %p796_p11 = scmp.lt.u32.totalorder %s792_s30, %s1013_s5 }
  0x39   :  { %p798_p12 = pnand %p796_p11, %p793_p10 }
  0x3b   :  { %801 = shalt.err (!%p798_p12)
}
  0x3c   :  { %s802_s15 = scalar_lea.vmem %s931_s18, 2048  ;;  %p807_p0 = scmp.lt.s32.totalorder %s931_s18, %s931_s18 }
  0x3d   :  { %p803_p13 = scmp.ne.s32.totalorder %s931_s18, %s802_s15  ;;  %p808_p1 = scmp.lt.s32.totalorder %s802_s15, %s802_s15 }
  0x3f   :  { %p809_p2 = por %p808_p1, %p807_p0 }
  0x41   :  { %p810_p3 = pnand %p809_p2, %p803_p13 }
  0x43   :  { %813 = shalt.err (!%p810_p3)
}
  0x44   :  { %69 = dma.hbm_to_vmem [thread:$0]  %s1013_s5, 2048, %s931_s18, [#allocation9], %s848_s1, %s848_s1, %s849_s10  }
  0x45   :  { %836 = dma.done.wait [#allocation3], 256  }
  0x46   :  { %837 = vsyncadd [#allocation3], 4294967040 }
  0x47   :  { %838 = dma.done.wait [#allocation6], 6144  }
  0x48   :  { %839 = vsyncadd [#allocation6], 4294961152 }
  0x49   :  { %840 = dma.done.wait [#allocation9], 2048  }
  0x4a   :  { %841 = vsyncadd [#allocation9], 4294965248  ;;  %v852_v0 = vmov 0.0   ;;  %v91_v1 = vld [vmem:[#allocation5 + $0x8] sm:$0xff]  ;;  %v93_v2 = vld [vmem:[#allocation5 + $0x18] sm:$0xff]  ;;  %s853_s23 = smov [#allocation10]  }
  0x4b   :  { %198 = vmatprep.mubr.f32.mxu0 %v852_v0  ;;  %v90_v3 = vld [vmem:[#allocation5] sm:$0xff]  ;;  %v608_v4 = vpack.c.bf16 %v93_v2, %v91_v1  ;;  %v92_v5 = vld [vmem:[#allocation5 + $0x10] sm:$0xff]  ;;  %v95_v6 = vld [vmem:[#allocation5 + $0x28] sm:$0xff]  ;;  %s482_s25 = sshll.u32 %s853_s23, 4  ;;  %s483_s25 = int_to_ptr.vmem [resolvable:$true] %s482_s25 }
  0x4c   :  { %v97_v7 = vld [vmem:[#allocation5 + $0x38] sm:$0xff]  ;;  %v610_v8 = vpack.c.bf16 %v92_v5, %v90_v3  ;;  %v94_v10 = vld [vmem:[#allocation5 + $0x20] sm:$0xff]  ;;  %v96_v11 = vld [vmem:[#allocation5 + $0x30] sm:$0xff]  ;;  %s814_s26 = scalar_lea.vmem %s483_s25, 256  ;;  %p819_p5 = scmp.lt.s32.totalorder %s483_s25, %s483_s25 }
  0x4d   :  { %v612_v9 = vpack.c.bf16 %v97_v7, %v95_v6  ;;  %v99_v12 = vld [vmem:[#allocation5 + $0x48] sm:$0xff]  ;;  %609 = vmatprep.subr.bf16.mxu0 %v608_v4  ;;  %v101_v13 = vld [vmem:[#allocation5 + $0x58] sm:$0xff]  ;;  %v614_v14 = vpack.c.bf16 %v96_v11, %v94_v10  ;;  %v98_v16 = vld [vmem:[#allocation5 + $0x40] sm:$0xff]  ;;  %p815_p4 = scmp.ne.s32.totalorder %s483_s25, %s814_s26  ;;  %p820_p6 = scmp.lt.s32.totalorder %s814_s26, %s814_s26 }
  0x4e   :  { %611 = vmatpush1.bf16.msra.mxu0 %v610_v8  ;;  %v616_v15 = vpack.c.bf16 %v101_v13, %v99_v12  ;;  %v100_v17 = vld [vmem:[#allocation5 + $0x50] sm:$0xff]  ;;  %v103_v18 = vld [vmem:[#allocation5 + $0x68] sm:$0xff]  ;;  %v105_v19 = vld [vmem:[#allocation5 + $0x78] sm:$0xff] }
  0x4f   :  { %613 = vmatprep.subr.bf16.mxu0 %v612_v9  ;;  %v618_v20 = vpack.c.bf16 %v100_v17, %v98_v16  ;;  %v620_v21 = vpack.c.bf16 %v105_v19, %v103_v18  ;;  %v102_v22 = vld [vmem:[#allocation5 + $0x60] sm:$0xff]  ;;  %v104_v23 = vld [vmem:[#allocation5 + $0x70] sm:$0xff]  ;;  %v107_v24 = vld [vmem:[#allocation5 + $0x88] sm:$0xff]  ;;  %p821_p7 = por %p820_p6, %p819_p5 }
  0x50   :  { %v109_v25 = vld [vmem:[#allocation5 + $0x98] sm:$0xff]  ;;  %v215_v26 = vld [vmem:[#allocation7] sm:$0xff]  ;;  %v216_v27 = vld [vmem:[#allocation7 + $0x8] sm:$0xff]  ;;  %v622_v28 = vpack.c.bf16 %v104_v23, %v102_v22 }
  0x51   :  { %v106_v29 = vld [vmem:[#allocation5 + $0x80] sm:$0xff]  ;;  %v640_v30 = vpack.c.bf16 %v216_v27, %v215_v26  ;;  %v217_v31 = vld [vmem:[#allocation7 + $0x10] sm:$0xff]  ;;  %v218_v32 = vld [vmem:[#allocation7 + $0x18] sm:$0xff]  ;;  %v624_v33 = vpack.c.bf16 %v109_v25, %v107_v24  ;;  %p822_p8 = pnand %p821_p7, %p815_p4 }
  0x52   :  { %615 = vmatpush1.bf16.msra.mxu0 %v614_v14  ;;  %v108_v34 = vld [vmem:[#allocation5 + $0x90] sm:$0xff]  ;;  %v644_v35 = vpack.c.bf16 %v218_v32, %v217_v31  ;;  %v219_v36 = vld [vmem:[#allocation7 + $0x20] sm:$0xff]  ;;  %v220_v37 = vld [vmem:[#allocation7 + $0x28] sm:$0xff]  ;;  %v124_v32 = vlaneseq }
  0x53   :  { %617 = vmatprep.subr.bf16.mxu0 %v616_v15  ;;  %v111_v38 = vld [vmem:[#allocation5 + $0xa8] sm:$0xff]  ;;  %v113_v39 = vld [vmem:[#allocation5 + $0xb8] sm:$0xff]  ;;  %641 = vmatprep.subr.bf16.mxu1 %v640_v30  ;;  %v626_v40 = vpack.c.bf16 %v108_v34, %v106_v29  ;;  %v110_v41 = vld [vmem:[#allocation5 + $0xa0] sm:$0xff]  ;;  %v648_v42 = vpack.c.bf16 %v220_v37, %v219_v36 }
  0x54   :  { %643 = vmatpush3.bf16.msra.mxu1 %v640_v30  ;;  %v628_v43 = vpack.c.bf16 %v113_v39, %v111_v38  ;;  %v112_v44 = vld [vmem:[#allocation5 + $0xb0] sm:$0xff]  ;;  %v222_v46 = vld [vmem:[#allocation7 + $0x38] sm:$0xff]  ;;  %v115_v47 = vld [vmem:[#allocation5 + $0xc8] sm:$0xff] }
  0x55   :  { %645 = vmatprep.subr.bf16.mxu1 %v644_v35  ;;  %v221_v45 = vld [vmem:[#allocation7 + $0x30] sm:$0xff]  ;;  %v117_v48 = vld [vmem:[#allocation5 + $0xd8] sm:$0xff]  ;;  %v630_v49 = vpack.c.bf16 %v112_v44, %v110_v41  ;;  %v114_v50 = vld [vmem:[#allocation5 + $0xc0] sm:$0xff] }
  0x56   :  { %619 = vmatpush1.bf16.msra.mxu0 %v618_v20  ;;  %v652_v51 = vpack.c.bf16 %v222_v46, %v221_v45  ;;  %v632_v52 = vpack.c.bf16 %v117_v48, %v115_v47  ;;  %v116_v53 = vld [vmem:[#allocation5 + $0xd0] sm:$0xff]  ;;  %v223_v54 = vld [vmem:[#allocation7 + $0x40] sm:$0xff]  ;;  %v224_v55 = vld [vmem:[#allocation7 + $0x48] sm:$0xff] }
  0x57   :  { %621 = vmatprep.subr.bf16.mxu0 %v620_v21  ;;  %v119_v56 = vld [vmem:[#allocation5 + $0xe8] sm:$0xff]  ;;  %v121_v57 = vld [vmem:[#allocation5 + $0xf8] sm:$0xff]  ;;  %v634_v58 = vpack.c.bf16 %v116_v53, %v114_v50  ;;  %v118_v59 = vld [vmem:[#allocation5 + $0xe0] sm:$0xff]  ;;  %v656_v60 = vpack.c.bf16 %v224_v55, %v223_v54 }
  0x58   :  { %647 = vmatpush3.bf16.msra.mxu1 %v644_v35  ;;  %v636_v61 = vpack.c.bf16 %v121_v57, %v119_v56  ;;  %v120_v62 = vld [vmem:[#allocation5 + $0xf0] sm:$0xff]  ;;  %v226_v1 = vld [vmem:[#allocation7 + $0x58] sm:$0xff]  ;;  %v227_v6 = vld [vmem:[#allocation7 + $0x60] sm:$0xff] }
  0x59   :  { %649 = vmatprep.subr.bf16.mxu1 %v648_v42  ;;  %v225_v63 = vld [vmem:[#allocation7 + $0x50] sm:$0xff]  ;;  %v638_v2 = vpack.c.bf16 %v120_v62, %v118_v59  ;;  %v973_v5 = vld [vmem:[#allocation2 + $0x8] sm:$0xff]  ;;  %v228_v7 = vld [vmem:[#allocation7 + $0x68] sm:$0xff] }
  0x5a   :  { %623 = vmatpush1.bf16.msra.mxu0 %v622_v28  ;;  %v660_v3 = vpack.c.bf16 %v226_v1, %v225_v63  ;;  %v969_v4 = vld [vmem:[#allocation2] sm:$0xff]  ;;  %v664_v8 = vpack.c.bf16 %v228_v7, %v227_v6  ;;  %v230_v10 = vld [vmem:[#allocation7 + $0x78] sm:$0xff]  ;;  %v313_v12 = vld [vmem:[#allocation8] sm:$0xff] }
  0x5b   :  { %625 = vmatprep.subr.bf16.mxu0 %v624_v33  ;;  %v229_v9 = vld [vmem:[#allocation7 + $0x70] sm:$0xff]  ;;  %v314_v13 = vld [vmem:[#allocation8 + $0x8] sm:$0xff]  ;;  %v316_v16 = vld [vmem:[#allocation8 + $0x18] sm:$0xff]  ;;  %v125_v33 = vshrl.u32 %v124_v32, 7 }
  0x5c   :  { %651 = vmatpush3.bf16.msra.mxu1 %v648_v42  ;;  %v668_v11 = vpack.c.bf16 %v230_v10, %v229_v9  ;;  %v315_v14 = vld [vmem:[#allocation8 + $0x10] sm:$0xff]  ;;  %v672_v15 = vpack.c.bf16 %v314_v13, %v313_v12  ;;  %v317_v17 = vld [vmem:[#allocation8 + $0x20] sm:$0xff]  ;;  %v318_v18 = vld [vmem:[#allocation8 + $0x28] sm:$0xff] }
  0x5d   :  { %653 = vmatprep.subr.bf16.mxu1 %v652_v51  ;;  %v680_v19 = vpack.c.bf16 %v318_v18, %v317_v17  ;;  %v319_v20 = vld [vmem:[#allocation8 + $0x30] sm:$0xff]  ;;  %v320_v21 = vld [vmem:[#allocation8 + $0x38] sm:$0xff]  ;;  %v321_v23 = vld [vmem:[#allocation8 + $0x40] sm:$0xff]  ;;  %v126_v34 = vsub.s32 0, %v125_v33  ;;  %v130_v55 = vsub.s32 1, %v125_v33 }
  0x5e   :  { %627 = vmatpush1.bf16.msra.mxu0 %v626_v40  ;;  %v684_v22 = vpack.c.bf16 %v320_v21, %v319_v20  ;;  %v322_v24 = vld [vmem:[#allocation8 + $0x48] sm:$0xff]  ;;  %v323_v26 = vld [vmem:[#allocation8 + $0x50] sm:$0xff]  ;;  %v324_v27 = vld [vmem:[#allocation8 + $0x58] sm:$0xff] }
  0x5f   :  { %629 = vmatprep.subr.bf16.mxu0 %v628_v43  ;;  %v688_v25 = vpack.c.bf16 %v322_v24, %v321_v23  ;;  %v692_v28 = vpack.c.bf16 %v324_v27, %v323_v26  ;;  %v325_v29 = vld [vmem:[#allocation8 + $0x60] sm:$0xff]  ;;  %v326_v30 = vld [vmem:[#allocation8 + $0x68] sm:$0xff]  ;;  %v122_v35 = vld [vmem:[%s1010_s2] sm:$0x3] }
  0x60   :  { %655 = vmatpush3.bf16.msra.mxu1 %v652_v51  ;;  %v696_v31 = vpack.c.bf16 %v326_v30, %v325_v29  ;;  %v127_v36 = vrot.slane %v122_v35, %v126_v34  ;;  %v327_v47 = vld [vmem:[#allocation8 + $0x70] sm:$0xff]  ;;  %v328_v48 = vld [vmem:[#allocation8 + $0x78] sm:$0xff]  ;;  %v131_v56 = vrot.slane %v122_v35, %v130_v55 }
  0x61   :  { %657 = vmatprep.subr.bf16.mxu1 %v656_v60  ;;  %v496_v50 = vld [vmem:[%s1012_s4] ss:$0 sm:$0xff] }
  0x62   :  { %631 = vmatpush1.bf16.msra.mxu0 %v630_v49  ;;  %v700_v49 = vpack.c.bf16 %v328_v48, %v327_v47  ;;  %v500_v34 = vld [vmem:[%s1015_s7] ss:$0 sm:$0xff] }
  0x63   :  { %633 = vmatprep.subr.bf16.mxu0 %v632_v52 }
  0x64   :  { %659 = vmatpush3.bf16.msra.mxu1 %v656_v60  ;;  %v497_v60 = vld [vmem:[%s1014_s6] ss:$0 sm:$0xff] }
  0x65   :  { %661 = vmatprep.subr.bf16.mxu1 %v660_v3 }
  0x66   :  { %635 = vmatpush1.bf16.msra.mxu0 %v634_v58 }
  0x67   :  { %637 = vmatprep.subr.bf16.mxu0 %v636_v61 }
  0x68   :  { %663 = vmatpush3.bf16.msra.mxu1 %v660_v3 }
  0x69   :  { %665 = vmatprep.subr.bf16.mxu1 %v664_v8 }
  0x6a   :  { %639 = vmatpush1.bf16.msra.mxu0 %v638_v2 }
  0x6b   :  { %673 = vmatprep.subr.bf16.mxu0 %v672_v15 }
  0x6c   :  { %667 = vmatpush3.bf16.msra.mxu1 %v664_v8 }
  0x6d   :  { %199 = vmatmul.mubr.f32.vlgmr.msra.gmra.mrb[0].mxu0 %v969_v4  ;;  %669 = vmatprep.subr.bf16.mxu1 %v668_v11 }
  0x6e   :  { %204 = vmatprep.mubr.f32.mxu0 %v852_v0  ;;  %v676_v0 = vpack.c.bf16 %v316_v16, %v315_v14  ;;  %675 = vmatpush3.bf16.msra.mxu0 %v672_v15 }
  0x70   :  { %671 = vmatpush3.bf16.msra.mxu1 %v668_v11  ;;  %677 = vmatprep.subr.bf16.mxu0 %v676_v0 }
  0x71   :  { %205 = vmatmul.mubr.f32.gmra.mrb[2].mxu0 %v973_v5 }
  0x72   :  { %679 = vmatpush3.bf16.msra.mxu0 %v676_v0 }
  0x73   :  { %681 = vmatprep.subr.bf16.mxu0 %v680_v19 }
  0x76   :  { %683 = vmatpush3.bf16.msra.mxu0 %v680_v19 }
  0x77   :  { %685 = vmatprep.subr.bf16.mxu0 %v684_v22 }
  0x7a   :  { %687 = vmatpush3.bf16.msra.mxu0 %v684_v22 }
  0x7b   :  { %689 = vmatprep.subr.bf16.mxu0 %v688_v25 }
  0x7e   :  { %691 = vmatpush3.bf16.msra.mxu0 %v688_v25 }
  0x7f   :  { %693 = vmatprep.subr.bf16.mxu0 %v692_v28 }
  0x82   :  { %695 = vmatpush3.bf16.msra.mxu0 %v692_v28 }
  0x83   :  { %697 = vmatprep.subr.bf16.mxu0 %v696_v31 }
  0x86   :  { %699 = vmatpush3.bf16.msra.mxu0 %v696_v31 }
  0x87   :  { %701 = vmatprep.subr.bf16.mxu0 %v700_v49 }
  0x8a   :  { %703 = vmatpush3.bf16.msra.mxu0 %v700_v49 }
 0x140   :  { %v200_v37 = vpop.f32.mrb[0].mxu0 }
 0x141   :  { %v201_v38 = vadd.f32 %v200_v37, %v127_v36  ;;  %v202_v39 = vpop.f32.mrb[1].mxu0 }
 0x142   :  { %v203_v58 = vadd.f32 %v202_v39, %v131_v56 }
 0x143   :  { %v211_v40 = vmul.f32 0.01, %v201_v38 }
 0x144   :  { %v206_v41 = vpop.f32.mrb[2].mxu0 }
 0x145   :  { %v207_v42 = vadd.f32 %v206_v41, %v127_v36  ;;  %v208_v43 = vpop.f32.mrb[3].mxu0  ;;  %v213_v44 = vmax.f32 %v201_v38, %v211_v40  ;;  %v501_v36 = vld [vmem:[%s1016_s8] ss:$0 sm:$0xff] }
 0x146   :  { %v209_v57 = vadd.f32 %v208_v43, %v131_v56 }
 0x147   :  { %v212_v45 = vmul.f32 0.01, %v207_v42  ;;  %570 = vmatprep.mubr.f32.mxu1 %v213_v44 }
 0x149   :  { %v214_v46 = vmax.f32 %v207_v42, %v212_v45 }
 0x14b   :  { %571 = vmatmul.mubr.f32.vlgmr.msra.gmra.mrb[0].mxu1 %v214_v46 }
 0x21e   :  { %v572_v51 = vpop.f32.mrb[0].mxu1 }
 0x21f   :  { %v304_v52 = vpop.f32.mrb[1].mxu1  ;;  %v310_v54 = vadd.f32 %v572_v51, %v496_v50 }
 0x220   :  { %v305_v53 = vadd.f32 %v496_v50, %v304_v52 }
 0x222   :  { %605 = vmatprep.mubr.f32.mxu0 %v305_v53 }
 0x223   :  { %606 = vmatmul.mubr.f32.vlgmr.msra.gmra.mrb[4].mxu0 %v310_v54 }
 0x2f6   :  { %v607_v59 = vpop.f32.mrb[4].mxu0 }
 0x2f7   :  { %v401_v61 = vadd.f32 %v607_v59, %v209_v57  ;;  %v395_v62 = vpop.f32.mrb[5].mxu0 }
 0x2f8   :  { %v396_v63 = vadd.f32 %v395_v62, %v203_v58 }
 0x2f9   :  { %v412_v1 = vadd.f32 %v497_v60, %v401_v61 }
 0x2fa   :  { %v411_v2 = vadd.f32 %v497_v60, %v396_v63 }
 0x2fb   :  { %v499_v3 = vmul.f32 -1.442695, %v412_v1 }
 0x2fc   :  { %v498_v6 = vmul.f32 -1.442695, %v411_v2 }
 0x2fd   :  { %714 = vpow2.f32 %v499_v3 }
 0x2fe   :  { %716 = vpow2.f32 %v498_v6 }
 0x307   :  { %v715_v7 = vpop.eup %714 }
 0x308   :  { %v717_v8 = vpop.eup %716  ;;  %v420_v9 = vadd.f32 1.0, %v715_v7 }
 0x309   :  { %v419_v10 = vadd.f32 1.0, %v717_v8 }
 0x30a   :  { %718 = vrcp.f32 %v420_v9 }
 0x30b   :  { %720 = vrcp.f32 %v419_v10 }
 0x314   :  { %v719_v11 = vpop.eup %718 }
 0x315   :  { %v721_v12 = vpop.eup %720  ;;  %v426_v14 = vmul.f32 %v719_v11, %v310_v54 }
 0x316   :  { %v425_v13 = vmul.f32 %v721_v12, %v305_v53 }
 0x317   :  { %v428_v0 = vadd.f32 %v426_v14, %v973_v5 }
 0x318   :  { %v427_v15 = vadd.f32 %v425_v13, %v969_v4 }
 0x319   :  { %v434_v17 = vmul.f32 %v428_v0, %v428_v0 }
 0x31a   :  { %429 = vadd.xlane.f32.xlu0 %v427_v15  ;;  %v433_v16 = vmul.f32 %v427_v15, %v427_v15 }
 0x31c   :  { %435 = vadd.xlane.f32.xlu1 %v433_v16 }
 0x31e   :  { %431 = vadd.xlane.f32.xlu0 %v428_v0 }
 0x320   :  { %437 = vadd.xlane.f32.xlu1 %v434_v17 }
 0x3a7   :  { %v430_v18 = vpop.xlane.xlu0 %429 }
 0x3a8   :  { %v439_v19 = vmul.f32 0.03125, %v430_v18 }
 0x3a9   :  { %v436_v20 = vpop.xlane.xlu1 %435 }
 0x3aa   :  { %v443_v21 = vmul.f32 %v439_v19, %v439_v19  ;;  %v441_v22 = vmul.f32 0.03125, %v436_v20  ;;  %v449_v32 = vsub.f32 %v427_v15, %v439_v19 }
 0x3ab   :  { %v432_v23 = vpop.xlane.xlu0 %431 }
 0x3ac   :  { %v445_v24 = vsub.f32 %v441_v22, %v443_v21  ;;  %v440_v25 = vmul.f32 0.03125, %v432_v23 }
 0x3ad   :  { %v438_v26 = vpop.xlane.xlu1 %437 }
 0x3ae   :  { %v447_v27 = vmax.f32 %v445_v24, 0.0  ;;  %v444_v28 = vmul.f32 %v440_v25, %v440_v25  ;;  %v442_v4 = vmul.f32 0.03125, %v438_v26  ;;  %v450_v37 = vsub.f32 %v428_v0, %v440_v25 }
 0x3b0   :  { %v451_v29 = vadd.f32 1e-05, %v447_v27  ;;  %v446_v30 = vsub.f32 %v442_v4, %v444_v28 }
 0x3b2   :  { %722 = vrsqrt.f32 %v451_v29  ;;  %v448_v5 = vmax.f32 %v446_v30, 0.0 }
 0x3b4   :  { %v452_v31 = vadd.f32 1e-05, %v448_v5 }
 0x3b6   :  { %724 = vrsqrt.f32 %v452_v31 }
 0x3bc   :  { %v723_v33 = vpop.eup %722 }
 0x3bd   :  { %v455_v35 = vmul.f32 %v723_v33, %v449_v32 }
 0x3bf   :  { %v464_v38 = vmul.f32 %v500_v34, %v455_v35 }
 0x3c0   :  { %v725_v39 = vpop.eup %724 }
 0x3c1   :  { %v456_v40 = vmul.f32 %v725_v39, %v450_v37  ;;  %v473_v41 = vadd.f32 %v501_v36, %v464_v38 }
 0x3c3   :  { %v465_v42 = vmul.f32 %v500_v34, %v456_v40  ;;  %475 = vst [vmem:[#allocation10] sm:$0xff] %v473_v41 }
 0x3c5   :  { %v474_v43 = vadd.f32 %v501_v36, %v465_v42 }
 0x3c7   :  { %476 = vst [vmem:[#allocation10 + $0x8] sm:$0xff] %v474_v43 }
 0x3c8   :  { %825 = shalt.err (!%p822_p8)
}
 0x3c9   :  { %s826_s0 = scalar_lea.hbm %s1017_s9, 256 }
 0x3ca   :  { %p827_p9 = scmp.ne.s32.totalorder %s1017_s9, %s826_s0  ;;  %p830_p10 = scmp.lt.u32.totalorder %s826_s0, %s1017_s9 }
 0x3cc   :  { %p832_p11 = pnand %p830_p10, %p827_p9 }
 0x3ce   :  { %835 = shalt.err (!%p832_p11)
}
 0x3cf   :  { %488 = dma.vmem_to_hbm [thread:$0]  %s483_s25, 256, %s1017_s9, [#allocation4], %s848_s1, %s848_s1, %s849_s10  }
 0x3d0   :  { %842 = dma.done.wait [#allocation4], 256  }
 0x3d1   :  { %843 = vsyncadd [#allocation4], 4294967040 }
 0x3d2   :  { %492 = vsyncpa [#allocation3], 1 }
 0x3d3   :  { %493 = vsyncpa [#allocation6], 1 }
 0x3d4   :  { %494 = vsyncpa [#allocation9], 1 }
 0x3d5   :  { %495 = vsyncpa [#allocation4], 1 }

// kernel: tpu_custom_call.1
= control target key start
LH: loop header
LB: loop body
LE: loop exit
PB: predicated region body
PF: predicated region fallthrough
CT: control target
= control target key end

     0   :  { %14 = vsyncpa [#allocation3], 0  ;;  %s1008_s0 = inlined_call_operand.hbm [shape: f32[16,128], index: 0, kind: input, shape index: {}]   ;;  %s1009_s1 = inlined_call_operand.hbm [shape: f32[128,256], index: 1, kind: input, shape index: {}]   ;;  %s1010_s2 = inlined_call_operand.vmem [shape: f32[1,256], index: 2, kind: input, shape index: {}]   ;;  %s1011_s3 = inlined_call_operand.hbm [shape: f32[128,128], index: 3, kind: input, shape index: {}]   ;;  %s1012_s4 = inlined_call_operand.vmem [shape: f32[1,128], index: 4, kind: input, shape index: {}]   ;;  %s1013_s5 = inlined_call_operand.hbm [shape: f32[128,128], index: 5, kind: input, shape index: {}]   ;;  %s1014_s6 = inlined_call_operand.vmem [shape: f32[1,128], index: 6, kind: input, shape index: {}]   ;;  %s1015_s7 = inlined_call_operand.vmem [shape: f32[1,128], index: 7, kind: input, shape index: {}]   ;;  %s1016_s8 = inlined_call_operand.vmem [shape: f32[1,128], index: 8, kind: input, shape index: {}]   ;;  %s1017_s9 = inlined_call_operand.hbm [shape: f32[16,128], index: 9, kind: output, shape index: {}]  }
   0x1   :  { %15 = vsyncpa [#allocation6], 0 }
   0x2   :  { %16 = vsyncpa [#allocation9], 0 }
   0x3   :  { %17 = vsyncpa [#allocation4], 0  ;;  %s844_s30 = smov [#allocation5]   ;;  %s726_s13 = scalar_lea.hbm %s1009_s1, 4096 }
   0x4   :  { %s35_s10 = sshll.u32 %s844_s30, 4  ;;  %p727_p0 = scmp.ne.s32.totalorder %s1009_s1, %s726_s13  ;;  %s36_s10 = int_to_ptr.vmem [resolvable:$true] %s35_s10 }
   0x5   :  { %p730_p1 = scmp.lt.u32.totalorder %s726_s13, %s1009_s1 }
   0x7   :  { %p732_p2 = pnand %p730_p1, %p727_p0 }
   0x9   :  { %735 = shalt.err (!%p732_p2)
}
   0xa   :  { %s736_s18 = scalar_lea.vmem %s36_s10, 4096  ;;  %p741_p4 = scmp.lt.s32.totalorder %s36_s10, %s36_s10 }
   0xb   :  { %p737_p3 = scmp.ne.s32.totalorder %s36_s10, %s736_s18  ;;  %p742_p5 = scmp.lt.s32.totalorder %s736_s18, %s736_s18 }
   0xd   :  { %p743_p6 = por %p742_p5, %p741_p4 }
   0xf   :  { %p744_p7 = pnand %p743_p6, %p737_p3 }
  0x11   :  { %747 = shalt.err (!%p744_p7)
}
  0x12   :  { %s845_s19 = smov 256   ;;  %s846_s20 = smov 16  }
  0x13   :  { %41 = dma.hbm_to_vmem [thread:$0]  %s1009_s1, 4096, %s36_s10, [#allocation6], %s845_s19, %s845_s19, %s846_s20  }
  0x14   :  { %s847_s23 = smov [#allocation2]   ;;  %s748_s27 = scalar_lea.hbm %s1008_s0, 256 }
  0x15   :  { %s23_s24 = sshll.u32 %s847_s23, 4  ;;  %p749_p8 = scmp.ne.s32.totalorder %s1008_s0, %s748_s27  ;;  %s24_s24 = int_to_ptr.vmem [resolvable:$true] %s23_s24 }
  0x16   :  { %p752_p9 = scmp.lt.u32.totalorder %s748_s27, %s1008_s0 }
  0x18   :  { %p754_p10 = pnand %p752_p9, %p749_p8 }
  0x1a   :  { %757 = shalt.err (!%p754_p10)
}
  0x1b   :  { %s758_s12 = scalar_lea.vmem %s24_s24, 256  ;;  %p763_p12 = scmp.lt.s32.totalorder %s24_s24, %s24_s24 }
  0x1c   :  { %p759_p11 = scmp.ne.s32.totalorder %s24_s24, %s758_s12  ;;  %p764_p13 = scmp.lt.s32.totalorder %s758_s12, %s758_s12 }
  0x1e   :  { %p765_p0 = por %p764_p13, %p763_p12 }
  0x20   :  { %p766_p1 = pnand %p765_p0, %p759_p11 }
  0x22   :  { %769 = shalt.err (!%p766_p1)
}
  0x23   :  { %s848_s1 = smov 128   ;;  %s849_s10 = smov 8  }
  0x24   :  { %29 = dma.hbm_to_vmem [thread:$0]  %s1008_s0, 256, %s24_s24, [#allocation3], %s848_s1, %s848_s1, %s849_s10  }
  0x25   :  { %s850_s15 = smov [#allocation7]   ;;  %s851_s17 = smov [#allocation8]  }
  0x26   :  { %s49_s16 = sshll.u32 %s850_s15, 4  ;;  %s63_s18 = sshll.u32 %s851_s17, 4  ;;  %s50_s16 = int_to_ptr.vmem [resolvable:$true] %s49_s16  ;;  %s931_s18 = int_to_ptr.vmem [resolvable:$true] %s63_s18 }
  0x27   :  { %s770_s21 = scalar_lea.hbm %s1011_s3, 2048 }
  0x28   :  { %p771_p2 = scmp.ne.s32.totalorder %s1011_s3, %s770_s21  ;;  %p774_p3 = scmp.lt.u32.totalorder %s770_s21, %s1011_s3 }
  0x2a   :  { %p776_p4 = pnand %p774_p3, %p771_p2 }
  0x2c   :  { %779 = shalt.err (!%p776_p4)
}
  0x2d   :  { %s780_s0 = scalar_lea.vmem %s50_s16, 2048  ;;  %p785_p6 = scmp.lt.s32.totalorder %s50_s16, %s50_s16 }
  0x2e   :  { %p781_p5 = scmp.ne.s32.totalorder %s50_s16, %s780_s0  ;;  %p786_p7 = scmp.lt.s32.totalorder %s780_s0, %s780_s0 }
  0x30   :  { %p787_p8 = por %p786_p7, %p785_p6 }
  0x32   :  { %p788_p9 = pnand %p787_p8, %p781_p5 }
  0x34   :  { %791 = shalt.err (!%p788_p9)
}
  0x35   :  { %55 = dma.hbm_to_vmem [thread:$0]  %s1011_s3, 2048, %s50_s16, [#allocation6], %s848_s1, %s848_s1, %s849_s10  }
  0x36   :  { %s792_s30 = scalar_lea.hbm %s1013_s5, 2048 }
  0x37   :  { %p793_p10 = scmp.ne.s32.totalorder %s1013_s5, %s792_s30  ;;  %p796_p11 = scmp.lt.u32.totalorder %s792_s30, %s1013_s5 }
  0x39   :  { %p798_p12 = pnand %p796_p11, %p793_p10 }
  0x3b   :  { %801 = shalt.err (!%p798_p12)
}
  0x3c   :  { %s802_s15 = scalar_lea.vmem %s931_s18, 2048  ;;  %p807_p0 = scmp.lt.s32.totalorder %s931_s18, %s931_s18 }
  0x3d   :  { %p803_p13 = scmp.ne.s32.totalorder %s931_s18, %s802_s15  ;;  %p808_p1 = scmp.lt.s32.totalorder %s802_s15, %s802_s15 }
  0x3f   :  { %p809_p2 = por %p808_p1, %p807_p0 }
  0x41   :  { %p810_p3 = pnand %p809_p2, %p803_p13 }
  0x43   :  { %813 = shalt.err (!%p810_p3)
}
  0x44   :  { %69 = dma.hbm_to_vmem [thread:$0]  %s1013_s5, 2048, %s931_s18, [#allocation9], %s848_s1, %s848_s1, %s849_s10  }
  0x45   :  { %836 = dma.done.wait [#allocation3], 256  }
  0x46   :  { %837 = vsyncadd [#allocation3], 4294967040 }
  0x47   :  { %838 = dma.done.wait [#allocation6], 6144  }
  0x48   :  { %839 = vsyncadd [#allocation6], 4294961152 }
  0x49   :  { %840 = dma.done.wait [#allocation9], 2048  }
  0x4a   :  { %841 = vsyncadd [#allocation9], 4294965248  ;;  %v852_v0 = vmov 0.0   ;;  %v91_v1 = vld [vmem:[#allocation5 + $0x8] sm:$0xff]  ;;  %v93_v2 = vld [vmem:[#allocation5 + $0x18] sm:$0xff]  ;;  %s853_s23 = smov [#allocation10]  }
  0x4b   :  { %198 = vmatprep.mubr.f32.mxu0 %v852_v0  ;;  %v90_v3 = vld [vmem:[#allocation5] sm:$0xff]  ;;  %v608_v4 = vpack.c.bf16 %v93_v2, %v91_v1  ;;  %v92_v5 = vld [vmem:[#allocation5 + $0x10] sm:$0xff]  ;;  %v95_v6 = vld [vmem:[#allocation5 + $0x28] sm:$0xff]  ;;  %s482_s25 = sshll.u32 %s853_s23, 4  ;;  %s483_s25 = int_to_ptr.vmem [resolvable:$true] %s482_s25 }
  0x4c   :  { %v97_v7 = vld [vmem:[#allocation5 + $0x38] sm:$0xff]  ;;  %v610_v8 = vpack.c.bf16 %v92_v5, %v90_v3  ;;  %v94_v10 = vld [vmem:[#allocation5 + $0x20] sm:$0xff]  ;;  %v96_v11 = vld [vmem:[#allocation5 + $0x30] sm:$0xff]  ;;  %s814_s26 = scalar_lea.vmem %s483_s25, 256  ;;  %p819_p5 = scmp.lt.s32.totalorder %s483_s25, %s483_s25 }
  0x4d   :  { %v612_v9 = vpack.c.bf16 %v97_v7, %v95_v6  ;;  %v99_v12 = vld [vmem:[#allocation5 + $0x48] sm:$0xff]  ;;  %609 = vmatprep.subr.bf16.mxu0 %v608_v4  ;;  %v101_v13 = vld [vmem:[#allocation5 + $0x58] sm:$0xff]  ;;  %v614_v14 = vpack.c.bf16 %v96_v11, %v94_v10  ;;  %v98_v16 = vld [vmem:[#allocation5 + $0x40] sm:$0xff]  ;;  %p815_p4 = scmp.ne.s32.totalorder %s483_s25, %s814_s26  ;;  %p820_p6 = scmp.lt.s32.totalorder %s814_s26, %s814_s26 }
  0x4e   :  { %611 = vmatpush1.bf16.msra.mxu0 %v610_v8  ;;  %v616_v15 = vpack.c.bf16 %v101_v13, %v99_v12  ;;  %v100_v17 = vld [vmem:[#allocation5 + $0x50] sm:$0xff]  ;;  %v103_v18 = vld [vmem:[#allocation5 + $0x68] sm:$0xff]  ;;  %v105_v19 = vld [vmem:[#allocation5 + $0x78] sm:$0xff] }
  0x4f   :  { %613 = vmatprep.subr.bf16.mxu0 %v612_v9  ;;  %v618_v20 = vpack.c.bf16 %v100_v17, %v98_v16  ;;  %v620_v21 = vpack.c.bf16 %v105_v19, %v103_v18  ;;  %v102_v22 = vld [vmem:[#allocation5 + $0x60] sm:$0xff]  ;;  %v104_v23 = vld [vmem:[#allocation5 + $0x70] sm:$0xff]  ;;  %v107_v24 = vld [vmem:[#allocation5 + $0x88] sm:$0xff]  ;;  %p821_p7 = por %p820_p6, %p819_p5 }
  0x50   :  { %v109_v25 = vld [vmem:[#allocation5 + $0x98] sm:$0xff]  ;;  %v215_v26 = vld [vmem:[#allocation7] sm:$0xff]  ;;  %v216_v27 = vld [vmem:[#allocation7 + $0x8] sm:$0xff]  ;;  %v622_v28 = vpack.c.bf16 %v104_v23, %v102_v22 }
  0x51   :  { %v106_v29 = vld [vmem:[#allocation5 + $0x80] sm:$0xff]  ;;  %v640_v30 = vpack.c.bf16 %v216_v27, %v215_v26  ;;  %v217_v31 = vld [vmem:[#allocation7 + $0x10] sm:$0xff]  ;;  %v218_v32 = vld [vmem:[#allocation7 + $0x18] sm:$0xff]  ;;  %v624_v33 = vpack.c.bf16 %v109_v25, %v107_v24  ;;  %p822_p8 = pnand %p821_p7, %p815_p4 }
  0x52   :  { %615 = vmatpush1.bf16.msra.mxu0 %v614_v14  ;;  %v108_v34 = vld [vmem:[#allocation5 + $0x90] sm:$0xff]  ;;  %v644_v35 = vpack.c.bf16 %v218_v32, %v217_v31  ;;  %v219_v36 = vld [vmem:[#allocation7 + $0x20] sm:$0xff]  ;;  %v220_v37 = vld [vmem:[#allocation7 + $0x28] sm:$0xff]  ;;  %v124_v32 = vlaneseq }
  0x53   :  { %617 = vmatprep.subr.bf16.mxu0 %v616_v15  ;;  %v111_v38 = vld [vmem:[#allocation5 + $0xa8] sm:$0xff]  ;;  %v113_v39 = vld [vmem:[#allocation5 + $0xb8] sm:$0xff]  ;;  %641 = vmatprep.subr.bf16.mxu1 %v640_v30  ;;  %v626_v40 = vpack.c.bf16 %v108_v34, %v106_v29  ;;  %v110_v41 = vld [vmem:[#allocation5 + $0xa0] sm:$0xff]  ;;  %v648_v42 = vpack.c.bf16 %v220_v37, %v219_v36 }
  0x54   :  { %643 = vmatpush3.bf16.msra.mxu1 %v640_v30  ;;  %v628_v43 = vpack.c.bf16 %v113_v39, %v111_v38  ;;  %v112_v44 = vld [vmem:[#allocation5 + $0xb0] sm:$0xff]  ;;  %v222_v46 = vld [vmem:[#allocation7 + $0x38] sm:$0xff]  ;;  %v115_v47 = vld [vmem:[#allocation5 + $0xc8] sm:$0xff] }
  0x55   :  { %645 = vmatprep.subr.bf16.mxu1 %v644_v35  ;;  %v221_v45 = vld [vmem:[#allocation7 + $0x30] sm:$0xff]  ;;  %v117_v48 = vld [vmem:[#allocation5 + $0xd8] sm:$0xff]  ;;  %v630_v49 = vpack.c.bf16 %v112_v44, %v110_v41  ;;  %v114_v50 = vld [vmem:[#allocation5 + $0xc0] sm:$0xff] }
  0x56   :  { %619 = vmatpush1.bf16.msra.mxu0 %v618_v20  ;;  %v652_v51 = vpack.c.bf16 %v222_v46, %v221_v45  ;;  %v632_v52 = vpack.c.bf16 %v117_v48, %v115_v47  ;;  %v116_v53 = vld [vmem:[#allocation5 + $0xd0] sm:$0xff]  ;;  %v223_v54 = vld [vmem:[#allocation7 + $0x40] sm:$0xff]  ;;  %v224_v55 = vld [vmem:[#allocation7 + $0x48] sm:$0xff] }
  0x57   :  { %621 = vmatprep.subr.bf16.mxu0 %v620_v21  ;;  %v119_v56 = vld [vmem:[#allocation5 + $0xe8] sm:$0xff]  ;;  %v121_v57 = vld [vmem:[#allocation5 + $0xf8] sm:$0xff]  ;;  %v634_v58 = vpack.c.bf16 %v116_v53, %v114_v50  ;;  %v118_v59 = vld [vmem:[#allocation5 + $0xe0] sm:$0xff]  ;;  %v656_v60 = vpack.c.bf16 %v224_v55, %v223_v54 }
  0x58   :  { %647 = vmatpush3.bf16.msra.mxu1 %v644_v35  ;;  %v636_v61 = vpack.c.bf16 %v121_v57, %v119_v56  ;;  %v120_v62 = vld [vmem:[#allocation5 + $0xf0] sm:$0xff]  ;;  %v226_v1 = vld [vmem:[#allocation7 + $0x58] sm:$0xff]  ;;  %v227_v6 = vld [vmem:[#allocation7 + $0x60] sm:$0xff] }
  0x59   :  { %649 = vmatprep.subr.bf16.mxu1 %v648_v42  ;;  %v225_v63 = vld [vmem:[#allocation7 + $0x50] sm:$0xff]  ;;  %v638_v2 = vpack.c.bf16 %v120_v62, %v118_v59  ;;  %v973_v5 = vld [vmem:[#allocation2 + $0x8] sm:$0xff]  ;;  %v228_v7 = vld [vmem:[#allocation7 + $0x68] sm:$0xff] }
  0x5a   :  { %623 = vmatpush1.bf16.msra.mxu0 %v622_v28  ;;  %v660_v3 = vpack.c.bf16 %v226_v1, %v225_v63  ;;  %v969_v4 = vld [vmem:[#allocation2] sm:$0xff]  ;;  %v664_v8 = vpack.c.bf16 %v228_v7, %v227_v6  ;;  %v230_v10 = vld [vmem:[#allocation7 + $0x78] sm:$0xff]  ;;  %v313_v12 = vld [vmem:[#allocation8] sm:$0xff] }
  0x5b   :  { %625 = vmatprep.subr.bf16.mxu0 %v624_v33  ;;  %v229_v9 = vld [vmem:[#allocation7 + $0x70] sm:$0xff]  ;;  %v314_v13 = vld [vmem:[#allocation8 + $0x8] sm:$0xff]  ;;  %v316_v16 = vld [vmem:[#allocation8 + $0x18] sm:$0xff]  ;;  %v125_v33 = vshrl.u32 %v124_v32, 7 }
  0x5c   :  { %651 = vmatpush3.bf16.msra.mxu1 %v648_v42  ;;  %v668_v11 = vpack.c.bf16 %v230_v10, %v229_v9  ;;  %v315_v14 = vld [vmem:[#allocation8 + $0x10] sm:$0xff]  ;;  %v672_v15 = vpack.c.bf16 %v314_v13, %v313_v12  ;;  %v317_v17 = vld [vmem:[#allocation8 + $0x20] sm:$0xff]  ;;  %v318_v18 = vld [vmem:[#allocation8 + $0x28] sm:$0xff] }
  0x5d   :  { %653 = vmatprep.subr.bf16.mxu1 %v652_v51  ;;  %v680_v19 = vpack.c.bf16 %v318_v18, %v317_v17  ;;  %v319_v20 = vld [vmem:[#allocation8 + $0x30] sm:$0xff]  ;;  %v320_v21 = vld [vmem:[#allocation8 + $0x38] sm:$0xff]  ;;  %v321_v23 = vld [vmem:[#allocation8 + $0x40] sm:$0xff]  ;;  %v126_v34 = vsub.s32 0, %v125_v33  ;;  %v130_v55 = vsub.s32 1, %v125_v33 }
  0x5e   :  { %627 = vmatpush1.bf16.msra.mxu0 %v626_v40  ;;  %v684_v22 = vpack.c.bf16 %v320_v21, %v319_v20  ;;  %v322_v24 = vld [vmem:[#allocation8 + $0x48] sm:$0xff]  ;;  %v323_v26 = vld [vmem:[#allocation8 + $0x50] sm:$0xff]  ;;  %v324_v27 = vld [vmem:[#allocation8 + $0x58] sm:$0xff] }
  0x5f   :  { %629 = vmatprep.subr.bf16.mxu0 %v628_v43  ;;  %v688_v25 = vpack.c.bf16 %v322_v24, %v321_v23  ;;  %v692_v28 = vpack.c.bf16 %v324_v27, %v323_v26  ;;  %v325_v29 = vld [vmem:[#allocation8 + $0x60] sm:$0xff]  ;;  %v326_v30 = vld [vmem:[#allocation8 + $0x68] sm:$0xff]  ;;  %v122_v35 = vld [vmem:[%s1010_s2] sm:$0x3] }
  0x60   :  { %655 = vmatpush3.bf16.msra.mxu1 %v652_v51  ;;  %v696_v31 = vpack.c.bf16 %v326_v30, %v325_v29  ;;  %v127_v36 = vrot.slane %v122_v35, %v126_v34  ;;  %v327_v47 = vld [vmem:[#allocation8 + $0x70] sm:$0xff]  ;;  %v328_v48 = vld [vmem:[#allocation8 + $0x78] sm:$0xff]  ;;  %v131_v56 = vrot.slane %v122_v35, %v130_v55 }
  0x61   :  { %657 = vmatprep.subr.bf16.mxu1 %v656_v60  ;;  %v496_v50 = vld [vmem:[%s1012_s4] ss:$0 sm:$0xff] }
  0x62   :  { %631 = vmatpush1.bf16.msra.mxu0 %v630_v49  ;;  %v700_v49 = vpack.c.bf16 %v328_v48, %v327_v47  ;;  %v500_v34 = vld [vmem:[%s1015_s7] ss:$0 sm:$0xff] }
  0x63   :  { %633 = vmatprep.subr.bf16.mxu0 %v632_v52 }
  0x64   :  { %659 = vmatpush3.bf16.msra.mxu1 %v656_v60  ;;  %v497_v60 = vld [vmem:[%s1014_s6] ss:$0 sm:$0xff] }
  0x65   :  { %661 = vmatprep.subr.bf16.mxu1 %v660_v3 }
  0x66   :  { %635 = vmatpush1.bf16.msra.mxu0 %v634_v58 }
  0x67   :  { %637 = vmatprep.subr.bf16.mxu0 %v636_v61 }
  0x68   :  { %663 = vmatpush3.bf16.msra.mxu1 %v660_v3 }
  0x69   :  { %665 = vmatprep.subr.bf16.mxu1 %v664_v8 }
  0x6a   :  { %639 = vmatpush1.bf16.msra.mxu0 %v638_v2 }
  0x6b   :  { %673 = vmatprep.subr.bf16.mxu0 %v672_v15 }
  0x6c   :  { %667 = vmatpush3.bf16.msra.mxu1 %v664_v8 }
  0x6d   :  { %199 = vmatmul.mubr.f32.vlgmr.msra.gmra.mrb[0].mxu0 %v969_v4  ;;  %669 = vmatprep.subr.bf16.mxu1 %v668_v11 }
  0x6e   :  { %204 = vmatprep.mubr.f32.mxu0 %v852_v0  ;;  %v676_v0 = vpack.c.bf16 %v316_v16, %v315_v14  ;;  %675 = vmatpush3.bf16.msra.mxu0 %v672_v15 }
  0x70   :  { %671 = vmatpush3.bf16.msra.mxu1 %v668_v11  ;;  %677 = vmatprep.subr.bf16.mxu0 %v676_v0 }
  0x71   :  { %205 = vmatmul.mubr.f32.gmra.mrb[2].mxu0 %v973_v5 }
  0x72   :  { %679 = vmatpush3.bf16.msra.mxu0 %v676_v0 }
  0x73   :  { %681 = vmatprep.subr.bf16.mxu0 %v680_v19 }
  0x76   :  { %683 = vmatpush3.bf16.msra.mxu0 %v680_v19 }
  0x77   :  { %685 = vmatprep.subr.bf16.mxu0 %v684_v22 }
  0x7a   :  { %687 = vmatpush3.bf16.msra.mxu0 %v684_v22 }
  0x7b   :  { %689 = vmatprep.subr.bf16.mxu0 %v688_v25 }
  0x7e   :  { %691 = vmatpush3.bf16.msra.mxu0 %v688_v25 }
  0x7f   :  { %693 = vmatprep.subr.bf16.mxu0 %v692_v28 }
  0x82   :  { %695 = vmatpush3.bf16.msra.mxu0 %v692_v28 }
  0x83   :  { %697 = vmatprep.subr.bf16.mxu0 %v696_v31 }
  0x86   :  { %699 = vmatpush3.bf16.msra.mxu0 %v696_v31 }
  0x87   :  { %701 = vmatprep.subr.bf16.mxu0 %v700_v49 }
  0x8a   :  { %703 = vmatpush3.bf16.msra.mxu0 %v700_v49 }
 0x140   :  { %v200_v37 = vpop.f32.mrb[0].mxu0 }
 0x141   :  { %v201_v38 = vadd.f32 %v200_v37, %v127_v36  ;;  %v202_v39 = vpop.f32.mrb[1].mxu0 }
 0x142   :  { %v203_v58 = vadd.f32 %v202_v39, %v131_v56 }
 0x143   :  { %v211_v40 = vmul.f32 0.01, %v201_v38 }
 0x144   :  { %v206_v41 = vpop.f32.mrb[2].mxu0 }
 0x145   :  { %v207_v42 = vadd.f32 %v206_v41, %v127_v36  ;;  %v208_v43 = vpop.f32.mrb[3].mxu0  ;;  %v213_v44 = vmax.f32 %v201_v38, %v211_v40  ;;  %v501_v36 = vld [vmem:[%s1016_s8] ss:$0 sm:$0xff] }
 0x146   :  { %v209_v57 = vadd.f32 %v208_v43, %v131_v56 }
 0x147   :  { %v212_v45 = vmul.f32 0.01, %v207_v42  ;;  %570 = vmatprep.mubr.f32.mxu1 %v213_v44 }
 0x149   :  { %v214_v46 = vmax.f32 %v207_v42, %v212_v45 }
 0x14b   :  { %571 = vmatmul.mubr.f32.vlgmr.msra.gmra.mrb[0].mxu1 %v214_v46 }
 0x21e   :  { %v572_v51 = vpop.f32.mrb[0].mxu1 }
 0x21f   :  { %v304_v52 = vpop.f32.mrb[1].mxu1  ;;  %v310_v54 = vadd.f32 %v572_v51, %v496_v50 }
 0x220   :  { %v305_v53 = vadd.f32 %v496_v50, %v304_v52 }
 0x222   :  { %605 = vmatprep.mubr.f32.mxu0 %v305_v53 }
 0x223   :  { %606 = vmatmul.mubr.f32.vlgmr.msra.gmra.mrb[4].mxu0 %v310_v54 }
 0x2f6   :  { %v607_v59 = vpop.f32.mrb[4].mxu0 }
 0x2f7   :  { %v401_v61 = vadd.f32 %v607_v59, %v209_v57  ;;  %v395_v62 = vpop.f32.mrb[5].mxu0 }
 0x2f8   :  { %v396_v63 = vadd.f32 %v395_v62, %v203_v58 }
 0x2f9   :  { %v412_v1 = vadd.f32 %v497_v60, %v401_v61 }
 0x2fa   :  { %v411_v2 = vadd.f32 %v497_v60, %v396_v63 }
 0x2fb   :  { %v499_v3 = vmul.f32 -1.442695, %v412_v1 }
 0x2fc   :  { %v498_v6 = vmul.f32 -1.442695, %v411_v2 }
 0x2fd   :  { %714 = vpow2.f32 %v499_v3 }
 0x2fe   :  { %716 = vpow2.f32 %v498_v6 }
 0x307   :  { %v715_v7 = vpop.eup %714 }
 0x308   :  { %v717_v8 = vpop.eup %716  ;;  %v420_v9 = vadd.f32 1.0, %v715_v7 }
 0x309   :  { %v419_v10 = vadd.f32 1.0, %v717_v8 }
 0x30a   :  { %718 = vrcp.f32 %v420_v9 }
 0x30b   :  { %720 = vrcp.f32 %v419_v10 }
 0x314   :  { %v719_v11 = vpop.eup %718 }
 0x315   :  { %v721_v12 = vpop.eup %720  ;;  %v426_v14 = vmul.f32 %v719_v11, %v310_v54 }
 0x316   :  { %v425_v13 = vmul.f32 %v721_v12, %v305_v53 }
 0x317   :  { %v428_v0 = vadd.f32 %v426_v14, %v973_v5 }
 0x318   :  { %v427_v15 = vadd.f32 %v425_v13, %v969_v4 }
 0x319   :  { %v434_v17 = vmul.f32 %v428_v0, %v428_v0 }
 0x31a   :  { %429 = vadd.xlane.f32.xlu0 %v427_v15  ;;  %v433_v16 = vmul.f32 %v427_v15, %v427_v15 }
 0x31c   :  { %435 = vadd.xlane.f32.xlu1 %v433_v16 }
 0x31e   :  { %431 = vadd.xlane.f32.xlu0 %v428_v0 }
 0x320   :  { %437 = vadd.xlane.f32.xlu1 %v434_v17 }
 0x3a7   :  { %v430_v18 = vpop.xlane.xlu0 %429 }
 0x3a8   :  { %v439_v19 = vmul.f32 0.03125, %v430_v18 }
 0x3a9   :  { %v436_v20 = vpop.xlane.xlu1 %435 }
 0x3aa   :  { %v443_v21 = vmul.f32 %v439_v19, %v439_v19  ;;  %v441_v22 = vmul.f32 0.03125, %v436_v20  ;;  %v449_v32 = vsub.f32 %v427_v15, %v439_v19 }
 0x3ab   :  { %v432_v23 = vpop.xlane.xlu0 %431 }
 0x3ac   :  { %v445_v24 = vsub.f32 %v441_v22, %v443_v21  ;;  %v440_v25 = vmul.f32 0.03125, %v432_v23 }
 0x3ad   :  { %v438_v26 = vpop.xlane.xlu1 %437 }
 0x3ae   :  { %v447_v27 = vmax.f32 %v445_v24, 0.0  ;;  %v444_v28 = vmul.f32 %v440_v25, %v440_v25  ;;  %v442_v4 = vmul.f32 0.03125, %v438_v26  ;;  %v450_v37 = vsub.f32 %v428_v0, %v440_v25 }
 0x3b0   :  { %v451_v29 = vadd.f32 1e-05, %v447_v27  ;;  %v446_v30 = vsub.f32 %v442_v4, %v444_v28 }
 0x3b2   :  { %722 = vrsqrt.f32 %v451_v29  ;;  %v448_v5 = vmax.f32 %v446_v30, 0.0 }
 0x3b4   :  { %v452_v31 = vadd.f32 1e-05, %v448_v5 }
 0x3b6   :  { %724 = vrsqrt.f32 %v452_v31 }
 0x3bc   :  { %v723_v33 = vpop.eup %722 }
 0x3bd   :  { %v455_v35 = vmul.f32 %v723_v33, %v449_v32 }
 0x3bf   :  { %v464_v38 = vmul.f32 %v500_v34, %v455_v35 }
 0x3c0   :  { %v725_v39 = vpop.eup %724 }
 0x3c1   :  { %v456_v40 = vmul.f32 %v725_v39, %v450_v37  ;;  %v473_v41 = vadd.f32 %v501_v36, %v464_v38 }
 0x3c3   :  { %v465_v42 = vmul.f32 %v500_v34, %v456_v40  ;;  %475 = vst [vmem:[#allocation10] sm:$0xff] %v473_v41 }
 0x3c5   :  { %v474_v43 = vadd.f32 %v501_v36, %v465_v42 }
 0x3c7   :  { %476 = vst [vmem:[#allocation10 + $0x8] sm:$0xff] %v474_v43 }
 0x3c8   :  { %825 = shalt.err (!%p822_p8)
}
 0x3c9   :  { %s826_s0 = scalar_lea.hbm %s1017_s9, 256 }
 0x3ca   :  { %p827_p9 = scmp.ne.s32.totalorder %s1017_s9, %s826_s0  ;;  %p830_p10 = scmp.lt.u32.totalorder %s826_s0, %s1017_s9 }
 0x3cc   :  { %p832_p11 = pnand %p830_p10, %p827_p9 }
 0x3ce   :  { %835 = shalt.err (!%p832_p11)
}
 0x3cf   :  { %488 = dma.vmem_to_hbm [thread:$0]  %s483_s25, 256, %s1017_s9, [#allocation4], %s848_s1, %s848_s1, %s849_s10  }
 0x3d0   :  { %842 = dma.done.wait [#allocation4], 256  }
 0x3d1   :  { %843 = vsyncadd [#allocation4], 4294967040 }
 0x3d2   :  { %492 = vsyncpa [#allocation3], 1 }
 0x3d3   :  { %493 = vsyncpa [#allocation6], 1 }
 0x3d4   :  { %494 = vsyncpa [#allocation9], 1 }
 0x3d5   :  { %495 = vsyncpa [#allocation4], 1 }

</bundles_post_ra>
